<compile_context>
chip_gen: v5e
topology: v5e:2x2
jax: 0.10.0
libtpu: 0.0.40
codegen_flags: <defaults>
</compile_context>

<pallas_src>
import jax
import jax.numpy as jnp
from jax import lax
from jax.experimental import pallas as pl
from jax.experimental.pallas import tpu as pltpu  # noqa: F401

# ----------------------------- configuration --------------------------------
B        = 2      # batch
S_ENC    = 8      # encoder (query_embeds) sequence length
S_DEC    = 6      # label sequence length
S_PAD    = 8      # decoder length padded to one sublane tile
IN_SIZE  = 48     # input_size of the projection
D_MODEL  = 32     # t5 d_model (synthetic, small)
N_HEADS  = 4
D_KV     = 8      # per-head dim  (N_HEADS * D_KV == D_MODEL)
D_FF     = 64
VOCAB    = 128
LN_EPS   = 1e-5   # nn.LayerNorm default
RMS_EPS  = 1e-6   # T5LayerNorm default
Z        = B * N_HEADS
NEG_INF  = -1e9


# ------------------------------ kernel helpers -------------------------------
def _rmsnorm(x, w):
    var = jnp.mean(x * x, axis=-1, keepdims=True)
    return x * lax.rsqrt(var + RMS_EPS) * w


def _softmax_lastdim(s):
    m = jnp.max(s, axis=-1, keepdims=True)
    e = jnp.exp(s - m)
    return e * pl.reciprocal(jnp.sum(e, axis=-1, keepdims=True), approx=True)


def _bcast_heads(x2, s_len):
    # (B*s_len, D_MODEL) -> (Z, s_len, D_MODEL); replicate over heads.
    # Leading-dim reshapes/broadcast only -> no lane/sublane relayout.
    x4 = x2.reshape(B, 1, s_len, D_MODEL)
    x4 = jnp.broadcast_to(x4, (B, N_HEADS, s_len, D_MODEL))
    return x4.reshape(Z, s_len, D_MODEL)


def _attention(h2, kv2, s_q, s_kv, wq, wk, wv, wo, add_mask):
    # h2:(B*s_q, D)  kv2:(B*s_kv, D); weights z-stacked: wq/wk/wv:(Z, D, D_KV),
    # wo:(Z, D_KV, D); add_mask broadcastable to (Z, s_q, s_kv).
    # T5 attention: no 1/sqrt(d) score scaling.
    hz = _bcast_heads(h2, s_q)
    kz = _bcast_heads(kv2, s_kv)
    q = jnp.einsum("zqd,zde->zqe", hz, wq, preferred_element_type=jnp.float32)
    k = jnp.einsum("zmd,zde->zme", kz, wk, preferred_element_type=jnp.float32)
    v = jnp.einsum("zmd,zde->zme", kz, wv, preferred_element_type=jnp.float32)
    s = jnp.einsum("zqe,zme->zqm", q, k, preferred_element_type=jnp.float32)
    p = _softmax_lastdim(s + add_mask)
    ctx = jnp.einsum("zqm,zme->zqe", p, v, preferred_element_type=jnp.float32)
    o = jnp.einsum("zqe,zed->zqd", ctx, wo, preferred_element_type=jnp.float32)
    # sum the per-head output projections (== concat-heads @ W_o)
    return jnp.sum(o.reshape(B, N_HEADS, s_q, D_MODEL), axis=1).reshape(
        B * s_q, D_MODEL)


# ------------------------------ fused kernel ---------------------------------
def t5_fused_kernel(x_ref, ids_ref, causal_ref, enc_add_ref,
                    proj_w_ref, proj_b_ref, ln_g_ref, ln_b_ref,
                    sa_ln_ref, sa_q_ref, sa_k_ref, sa_v_ref, sa_o_ref,
                    ca_ln_ref, ca_q_ref, ca_k_ref, ca_v_ref, ca_o_ref,
                    ff_ln_ref, wi_ref, wo_ref,
                    fin_ln_ref, emb_ref, emb_t_ref,
                    out_ref):
    f32 = jnp.float32

    # --- 1) input projection + LayerNorm on the query embeds (encoder side) --
    y = jnp.dot(x_ref[...], proj_w_ref[...], preferred_element_type=f32)
    y = y + proj_b_ref[...]
    mean = jnp.mean(y, axis=-1, keepdims=True)
    c = y - mean
    var = jnp.mean(c * c, axis=-1, keepdims=True)
    enc = c * lax.rsqrt(var + LN_EPS) * ln_g_ref[...] + ln_b_ref[...]

    # --- 2) decoder-input embedding lookup: one_hot(ids) @ emb on the MXU ----
    vocab_iota = lax.broadcasted_iota(jnp.int32, (B * S_PAD, VOCAB), 1)
    one_hot = (vocab_iota == ids_ref[...]).astype(f32)
    x = jnp.dot(one_hot, emb_ref[...], preferred_element_type=f32)

    # --- 3) causal self attention --------------------------------------------
    # TODO(synk): T5 relative-position attention bias omitted.
    h = _rmsnorm(x, sa_ln_ref[...])
    x = x + _attention(h, h, S_PAD, S_PAD,
                       sa_q_ref[...], sa_k_ref[...], sa_v_ref[...],
                       sa_o_ref[...], causal_ref[...])

    # --- 4) cross attention over the projected query_embeds ------------------
    h = _rmsnorm(x, ca_ln_ref[...])
    x = x + _attention(h, enc, S_PAD, S_ENC,
                       ca_q_ref[...], ca_k_ref[...], ca_v_ref[...],
                       ca_o_ref[...], enc_add_ref[...])

    # --- 5) feed-forward (ReLU) ----------------------------------------------
    h = _rmsnorm(x, ff_ln_ref[...])
    h = jnp.maximum(jnp.dot(h, wi_ref[...], preferred_element_type=f32), 0.0)
    x = x + jnp.dot(h, wo_ref[...], preferred_element_type=f32)

    # --- 6) final RMSNorm + tied LM head (pre-transposed) + clamp(min=-100) --
    h = _rmsnorm(x, fin_ln_ref[...]) * (D_MODEL ** -0.5)
    logits = jnp.dot(h, emb_t_ref[...], preferred_element_type=f32)
    out_ref[...] = jnp.maximum(logits, -100.0)


# ------------------------------ wrapper ---------------------------------------
def t5_forward(query_embeds, attention_masks, labels, params):
    # shift-right labels -> decoder input ids (decoder_start_token_id = 0),
    # replace -100 with pad (0), pad seq to S_PAD.
    dec_ids = jnp.concatenate(
        [jnp.zeros((B, 1), jnp.int32), labels[:, :-1]], axis=1)
    dec_ids = jnp.where(dec_ids == -100, 0, dec_ids)
    dec_ids = jnp.pad(dec_ids, ((0, 0), (0, S_PAD - S_DEC)))
    dec_ids = dec_ids.reshape(B * S_PAD, 1).astype(jnp.int32)

    # flatten encoder tokens for the projection matmul
    x2d = query_embeds.reshape(B * S_ENC, IN_SIZE).astype(jnp.float32)

    # additive masks, precomputed once outside the kernel
    qi = lax.broadcasted_iota(jnp.int32, (S_PAD, S_PAD), 0)
    ki = lax.broadcasted_iota(jnp.int32, (S_PAD, S_PAD), 1)
    causal_add = jnp.where(ki <= qi, 0.0, NEG_INF).astype(jnp.float32)[None]
    enc_add = (1.0 - attention_masks.astype(jnp.float32)) * NEG_INF   # (B,S_ENC)
    enc_add_z = jnp.broadcast_to(
        enc_add[:, None, None, :], (B, N_HEADS, 1, S_ENC)).reshape(Z, 1, S_ENC)

    # per-head, z-stacked attention weights (host-side layout plumbing)
    def stack_in(w):   # (D_MODEL, H*D_KV) -> (Z, D_MODEL, D_KV)
        wh = jnp.transpose(w.reshape(D_MODEL, N_HEADS, D_KV), (1, 0, 2))
        return jnp.broadcast_to(
            wh[None], (B, N_HEADS, D_MODEL, D_KV)).reshape(Z, D_MODEL, D_KV)

    def stack_out(w):  # (H*D_KV, D_MODEL) -> (Z, D_KV, D_MODEL)
        wh = w.reshape(N_HEADS, D_KV, D_MODEL)
        return jnp.broadcast_to(
            wh[None], (B, N_HEADS, D_KV, D_MODEL)).reshape(Z, D_KV, D_MODEL)

    emb = params["emb"]
    args = (
        x2d, dec_ids, causal_add, enc_add_z,
        params["proj_w"], params["proj_b"], params["ln_g"], params["ln_b"],
        params["sa_ln"], stack_in(params["sa_q"]), stack_in(params["sa_k"]),
        stack_in(params["sa_v"]), stack_out(params["sa_o"]),
        params["ca_ln"], stack_in(params["ca_q"]), stack_in(params["ca_k"]),
        stack_in(params["ca_v"]), stack_out(params["ca_o"]),
        params["ff_ln"], params["wi"], params["wo"],
        params["fin_ln"], emb, emb.T,
    )

    out = pl.pallas_call(
        t5_fused_kernel,
        out_shape=jax.ShapeDtypeStruct((B * S_PAD, VOCAB), jnp.float32),
    )(*args)

    # drop the padded decoder rows
    return out.reshape(B, S_PAD, VOCAB)[:, :S_DEC, :]


# ----------------------------- parameter init --------------------------------
def init_params(key):
    ks = jax.random.split(key, 16)
    n = lambda k, shape: (0.05 * jax.random.normal(k, shape)).astype(jnp.float32)
    ones = lambda shape: jnp.ones(shape, jnp.float32)
    zeros = lambda shape: jnp.zeros(shape, jnp.float32)
    return {
        # input_proj: Linear + LayerNorm
        "proj_w": n(ks[0], (IN_SIZE, D_MODEL)),
        "proj_b": zeros((1, D_MODEL)),
        "ln_g": ones((1, D_MODEL)),
        "ln_b": zeros((1, D_MODEL)),
        # decoder block
        "sa_ln": ones((1, D_MODEL)),
        "sa_q": n(ks[1], (D_MODEL, N_HEADS * D_KV)),
        "sa_k": n(ks[2], (D_MODEL, N_HEADS * D_KV)),
        "sa_v": n(ks[3], (D_MODEL, N_HEADS * D_KV)),
        "sa_o": n(ks[4], (N_HEADS * D_KV, D_MODEL)),
        "ca_ln": ones((1, D_MODEL)),
        "ca_q": n(ks[5], (D_MODEL, N_HEADS * D_KV)),
        "ca_k": n(ks[6], (D_MODEL, N_HEADS * D_KV)),
        "ca_v": n(ks[7], (D_MODEL, N_HEADS * D_KV)),
        "ca_o": n(ks[8], (N_HEADS * D_KV, D_MODEL)),
        "ff_ln": ones((1, D_MODEL)),
        "wi": n(ks[9], (D_MODEL, D_FF)),
        "wo": n(ks[10], (D_FF, D_MODEL)),
        "fin_ln": ones((1, D_MODEL)),
        # shared (tied) token embedding / LM head
        "emb": n(ks[11], (VOCAB, D_MODEL)),
    }


if __name__ == "__main__":
    key = jax.random.PRNGKey(0)
    k_p, k_x, k_l = jax.random.split(key, 3)

    params = init_params(k_p)
    query_embeds = jax.random.normal(k_x, (B, S_ENC, IN_SIZE), jnp.float32)
    labels = jax.random.randint(k_l, (B, S_DEC), 1, VOCAB).astype(jnp.int32)
    attention_masks = jnp.array(
        [[1] * S_ENC, [1] * (S_ENC - 2) + [0, 0]], dtype=jnp.int32)

    logits = t5_forward(query_embeds, attention_masks, labels, params)
    jax.block_until_ready(logits)

    assert logits.shape == (B, S_DEC, VOCAB)
    assert bool(jnp.all(logits >= -100.0))
    assert bool(jnp.all(jnp.isfinite(logits)))
    print("KERNEL_OK")
</pallas_src>

<mosaic_0001>
module attributes {stable_mosaic.version = 11 : i64} {
  func.func @t5_fused_kernel(%arg0: memref<16x48xf32, #tpu.memory_space<vmem>>, %arg1: memref<16x1xi32, #tpu.memory_space<vmem>>, %arg2: memref<1x8x8xf32, #tpu.memory_space<vmem>>, %arg3: memref<8x1x8xf32, #tpu.memory_space<vmem>>, %arg4: memref<48x32xf32, #tpu.memory_space<vmem>>, %arg5: memref<1x32xf32, #tpu.memory_space<vmem>>, %arg6: memref<1x32xf32, #tpu.memory_space<vmem>>, %arg7: memref<1x32xf32, #tpu.memory_space<vmem>>, %arg8: memref<1x32xf32, #tpu.memory_space<vmem>>, %arg9: memref<8x32x8xf32, #tpu.memory_space<vmem>>, %arg10: memref<8x32x8xf32, #tpu.memory_space<vmem>>, %arg11: memref<8x32x8xf32, #tpu.memory_space<vmem>>, %arg12: memref<8x8x32xf32, #tpu.memory_space<vmem>>, %arg13: memref<1x32xf32, #tpu.memory_space<vmem>>, %arg14: memref<8x32x8xf32, #tpu.memory_space<vmem>>, %arg15: memref<8x32x8xf32, #tpu.memory_space<vmem>>, %arg16: memref<8x32x8xf32, #tpu.memory_space<vmem>>, %arg17: memref<8x8x32xf32, #tpu.memory_space<vmem>>, %arg18: memref<1x32xf32, #tpu.memory_space<vmem>>, %arg19: memref<32x64xf32, #tpu.memory_space<vmem>>, %arg20: memref<64x32xf32, #tpu.memory_space<vmem>>, %arg21: memref<1x32xf32, #tpu.memory_space<vmem>>, %arg22: memref<128x32xf32, #tpu.memory_space<vmem>>, %arg23: memref<32x128xf32, #tpu.memory_space<vmem>>, %arg24: memref<16x128xf32, #tpu.memory_space<vmem>>) attributes {dimension_semantics = [], scalar_prefetch = 0 : i64, scratch_operands = 0 : i64, tpu.core_type = #tpu.core_type<tc>} {
    %c0 = arith.constant 0 : index
    %c0_0 = arith.constant 0 : index
    %0 = vector.load %arg0[%c0, %c0_0] : memref<16x48xf32, #tpu.memory_space<vmem>>, vector<16x48xf32>
    %c0_1 = arith.constant 0 : index
    %c0_2 = arith.constant 0 : index
    %1 = vector.load %arg4[%c0_1, %c0_2] : memref<48x32xf32, #tpu.memory_space<vmem>>, vector<48x32xf32>
    %cst = arith.constant dense<0.000000e+00> : vector<16x32xf32>
    %2 = tpu.matmul %0, %1, %cst {dimension_numbers = #tpu.dot_dimension_numbers<[1], [0], [0], [1], [0, 0, 1, 1], [], []>} : vector<16x48xf32>, vector<48x32xf32>, vector<16x32xf32> -> vector<16x32xf32>
    %c0_3 = arith.constant 0 : index
    %c0_4 = arith.constant 0 : index
    %3 = vector.load %arg5[%c0_3, %c0_4] : memref<1x32xf32, #tpu.memory_space<vmem>>, vector<1x32xf32>
    %4 = vector.broadcast %3 : vector<1x32xf32> to vector<16x32xf32>
    %5 = arith.addf %2, %4 : vector<16x32xf32>
    %cst_5 = arith.constant dense<0.000000e+00> : vector<16xf32>
    %6 = vector.multi_reduction <add>, %5, %cst_5 [1] : vector<16x32xf32> to vector<16xf32>
    %7 = vector.shape_cast %6 : vector<16xf32> to vector<16x1xf32>
    %cst_6 = arith.constant 3.200000e+01 : f32
    %8 = vector.broadcast %cst_6 : f32 to vector<16x1xf32>
    %9 = arith.divf %7, %8 : vector<16x1xf32>
    %10 = vector.broadcast %9 : vector<16x1xf32> to vector<16x32xf32>
    %11 = arith.subf %5, %10 : vector<16x32xf32>
    %12 = arith.mulf %11, %11 : vector<16x32xf32>
    %cst_7 = arith.constant dense<0.000000e+00> : vector<16xf32>
    %13 = vector.multi_reduction <add>, %12, %cst_7 [1] : vector<16x32xf32> to vector<16xf32>
    %14 = vector.shape_cast %13 : vector<16xf32> to vector<16x1xf32>
    %cst_8 = arith.constant 3.200000e+01 : f32
    %15 = vector.broadcast %cst_8 : f32 to vector<16x1xf32>
    %16 = arith.divf %14, %15 : vector<16x1xf32>
    %cst_9 = arith.constant 9.99999974E-6 : f32
    %17 = vector.broadcast %cst_9 : f32 to vector<16x1xf32>
    %18 = arith.addf %16, %17 : vector<16x1xf32>
    %19 = math.rsqrt %18 : vector<16x1xf32>
    %20 = vector.broadcast %19 : vector<16x1xf32> to vector<16x32xf32>
    %21 = arith.mulf %11, %20 : vector<16x32xf32>
    %c0_10 = arith.constant 0 : index
    %c0_11 = arith.constant 0 : index
    %22 = vector.load %arg6[%c0_10, %c0_11] : memref<1x32xf32, #tpu.memory_space<vmem>>, vector<1x32xf32>
    %23 = vector.broadcast %22 : vector<1x32xf32> to vector<16x32xf32>
    %24 = arith.mulf %21, %23 : vector<16x32xf32>
    %c0_12 = arith.constant 0 : index
    %c0_13 = arith.constant 0 : index
    %25 = vector.load %arg7[%c0_12, %c0_13] : memref<1x32xf32, #tpu.memory_space<vmem>>, vector<1x32xf32>
    %26 = vector.broadcast %25 : vector<1x32xf32> to vector<16x32xf32>
    %27 = arith.addf %24, %26 : vector<16x32xf32>
    %28 = tpu.iota {dimensions = array<i32: 1>} : vector<16x128xi32>
    %c0_14 = arith.constant 0 : index
    %c0_15 = arith.constant 0 : index
    %29 = vector.load %arg1[%c0_14, %c0_15] : memref<16x1xi32, #tpu.memory_space<vmem>>, vector<16x1xi32>
    %30 = vector.broadcast %29 : vector<16x1xi32> to vector<16x128xi32>
    %31 = arith.cmpi eq, %28, %30 : vector<16x128xi32>
    %32 = arith.extui %31 : vector<16x128xi1> to vector<16x128xi32>
    %33 = arith.sitofp %32 : vector<16x128xi32> to vector<16x128xf32>
    %c0_16 = arith.constant 0 : index
    %c0_17 = arith.constant 0 : index
    %34 = vector.load %arg22[%c0_16, %c0_17] : memref<128x32xf32, #tpu.memory_space<vmem>>, vector<128x32xf32>
    %cst_18 = arith.constant dense<0.000000e+00> : vector<16x32xf32>
    %35 = tpu.matmul %33, %34, %cst_18 {dimension_numbers = #tpu.dot_dimension_numbers<[1], [0], [0], [1], [0, 0, 1, 1], [], []>} : vector<16x128xf32>, vector<128x32xf32>, vector<16x32xf32> -> vector<16x32xf32>
    %c0_19 = arith.constant 0 : index
    %c0_20 = arith.constant 0 : index
    %36 = vector.load %arg8[%c0_19, %c0_20] : memref<1x32xf32, #tpu.memory_space<vmem>>, vector<1x32xf32>
    %37 = arith.mulf %35, %35 : vector<16x32xf32>
    %cst_21 = arith.constant dense<0.000000e+00> : vector<16xf32>
    %38 = vector.multi_reduction <add>, %37, %cst_21 [1] : vector<16x32xf32> to vector<16xf32>
    %39 = vector.shape_cast %38 : vector<16xf32> to vector<16x1xf32>
    %cst_22 = arith.constant 3.200000e+01 : f32
    %40 = vector.broadcast %cst_22 : f32 to vector<16x1xf32>
    %41 = arith.divf %39, %40 : vector<16x1xf32>
    %cst_23 = arith.constant 9.99999997E-7 : f32
    %42 = vector.broadcast %cst_23 : f32 to vector<16x1xf32>
    %43 = arith.addf %41, %42 : vector<16x1xf32>
    %44 = math.rsqrt %43 : vector<16x1xf32>
    %45 = vector.broadcast %44 : vector<16x1xf32> to vector<16x32xf32>
    %46 = arith.mulf %35, %45 : vector<16x32xf32>
    %47 = vector.broadcast %36 : vector<1x32xf32> to vector<16x32xf32>
    %48 = arith.mulf %46, %47 : vector<16x32xf32>
    %c0_24 = arith.constant 0 : index
    %c0_25 = arith.constant 0 : index
    %c0_26 = arith.constant 0 : index
    %49 = vector.load %arg9[%c0_24, %c0_25, %c0_26] : memref<8x32x8xf32, #tpu.memory_space<vmem>>, vector<8x32x8xf32>
    %c0_27 = arith.constant 0 : index
    %c0_28 = arith.constant 0 : index
    %c0_29 = arith.constant 0 : index
    %50 = vector.load %arg10[%c0_27, %c0_28, %c0_29] : memref<8x32x8xf32, #tpu.memory_space<vmem>>, vector<8x32x8xf32>
    %c0_30 = arith.constant 0 : index
    %c0_31 = arith.constant 0 : index
    %c0_32 = arith.constant 0 : index
    %51 = vector.load %arg11[%c0_30, %c0_31, %c0_32] : memref<8x32x8xf32, #tpu.memory_space<vmem>>, vector<8x32x8xf32>
    %c0_33 = arith.constant 0 : index
    %c0_34 = arith.constant 0 : index
    %c0_35 = arith.constant 0 : index
    %52 = vector.load %arg12[%c0_33, %c0_34, %c0_35] : memref<8x8x32xf32, #tpu.memory_space<vmem>>, vector<8x8x32xf32>
    %c0_36 = arith.constant 0 : index
    %c0_37 = arith.constant 0 : index
    %c0_38 = arith.constant 0 : index
    %53 = vector.load %arg2[%c0_36, %c0_37, %c0_38] : memref<1x8x8xf32, #tpu.memory_space<vmem>>, vector<1x8x8xf32>
    %54 = vector.shape_cast %48 : vector<16x32xf32> to vector<2x1x8x32xf32>
    %55 = vector.shape_cast %54 : vector<2x1x8x32xf32> to vector<2x1x8x32xf32>
    %56 = vector.broadcast %55 : vector<2x1x8x32xf32> to vector<2x4x8x32xf32>
    %57 = vector.shape_cast %56 : vector<2x4x8x32xf32> to vector<8x8x32xf32>
    %58 = vector.shape_cast %48 : vector<16x32xf32> to vector<2x1x8x32xf32>
    %59 = vector.shape_cast %58 : vector<2x1x8x32xf32> to vector<2x1x8x32xf32>
    %60 = vector.broadcast %59 : vector<2x1x8x32xf32> to vector<2x4x8x32xf32>
    %61 = vector.shape_cast %60 : vector<2x4x8x32xf32> to vector<8x8x32xf32>
    "tpu.trace_start"() <{level = 10 : i32, message = "zqd,zde->zqe"}> : () -> ()
    %cst_39 = arith.constant dense<0.000000e+00> : vector<8x8x8xf32>
    %62 = tpu.matmul %57, %49, %cst_39 {dimension_numbers = #tpu.dot_dimension_numbers<[2], [1], [1], [2], [0, 0, 0, 1, 1, 2], [0], [0]>} : vector<8x8x32xf32>, vector<8x32x8xf32>, vector<8x8x8xf32> -> vector<8x8x8xf32>
    "tpu.trace_stop"() : () -> ()
    "tpu.trace_start"() <{level = 10 : i32, message = "zmd,zde->zme"}> : () -> ()
    %cst_40 = arith.constant dense<0.000000e+00> : vector<8x8x8xf32>
    %63 = tpu.matmul %61, %50, %cst_40 {dimension_numbers = #tpu.dot_dimension_numbers<[2], [1], [1], [2], [0, 0, 0, 1, 1, 2], [0], [0]>} : vector<8x8x32xf32>, vector<8x32x8xf32>, vector<8x8x8xf32> -> vector<8x8x8xf32>
    %cst_41 = arith.constant dense<0.000000e+00> : vector<8x8x8xf32>
    %64 = tpu.matmul %61, %51, %cst_41 {dimension_numbers = #tpu.dot_dimension_numbers<[2], [1], [1], [2], [0, 0, 0, 1, 1, 2], [0], [0]>} : vector<8x8x32xf32>, vector<8x32x8xf32>, vector<8x8x8xf32> -> vector<8x8x8xf32>
    "tpu.trace_stop"() : () -> ()
    "tpu.trace_start"() <{level = 10 : i32, message = "zqe,zme->zqm"}> : () -> ()
    %cst_42 = arith.constant dense<0.000000e+00> : vector<8x8x8xf32>
    %65 = tpu.matmul %62, %63, %cst_42 {dimension_numbers = #tpu.dot_dimension_numbers<[2], [2], [1], [1], [0, 0, 0, 1, 1, 1], [0], [0]>} : vector<8x8x8xf32>, vector<8x8x8xf32>, vector<8x8x8xf32> -> vector<8x8x8xf32>
    "tpu.trace_stop"() : () -> ()
    %66 = vector.broadcast %53 : vector<1x8x8xf32> to vector<8x8x8xf32>
    %67 = arith.addf %65, %66 : vector<8x8x8xf32>
    %cst_43 = arith.constant dense<0xFF800000> : vector<8x8xf32>
    %68 = vector.multi_reduction <maximumf>, %67, %cst_43 [2] : vector<8x8x8xf32> to vector<8x8xf32>
    %69 = vector.shape_cast %68 : vector<8x8xf32> to vector<8x8x1xf32>
    %70 = vector.broadcast %69 : vector<8x8x1xf32> to vector<8x8x8xf32>
    %71 = arith.subf %67, %70 : vector<8x8x8xf32>
    %72 = math.exp %71 : vector<8x8x8xf32>
    %cst_44 = arith.constant dense<0.000000e+00> : vector<8x8xf32>
    %73 = vector.multi_reduction <add>, %72, %cst_44 [2] : vector<8x8x8xf32> to vector<8x8xf32>
    %74 = vector.shape_cast %73 : vector<8x8xf32> to vector<8x8x1xf32>
    %75 = tpu.reciprocal %74 {approx = true} : vector<8x8x1xf32> -> vector<8x8x1xf32>
    %76 = vector.broadcast %75 : vector<8x8x1xf32> to vector<8x8x8xf32>
    %77 = arith.mulf %72, %76 : vector<8x8x8xf32>
    "tpu.trace_start"() <{level = 10 : i32, message = "zqm,zme->zqe"}> : () -> ()
    %cst_45 = arith.constant dense<0.000000e+00> : vector<8x8x8xf32>
    %78 = tpu.matmul %77, %64, %cst_45 {dimension_numbers = #tpu.dot_dimension_numbers<[2], [1], [1], [2], [0, 0, 0, 1, 1, 2], [0], [0]>} : vector<8x8x8xf32>, vector<8x8x8xf32>, vector<8x8x8xf32> -> vector<8x8x8xf32>
    "tpu.trace_stop"() : () -> ()
    "tpu.trace_start"() <{level = 10 : i32, message = "zqe,zed->zqd"}> : () -> ()
    %cst_46 = arith.constant dense<0.000000e+00> : vector<8x8x32xf32>
    %79 = tpu.matmul %78, %52, %cst_46 {dimension_numbers = #tpu.dot_dimension_numbers<[2], [1], [1], [2], [0, 0, 0, 1, 1, 2], [0], [0]>} : vector<8x8x8xf32>, vector<8x8x32xf32>, vector<8x8x32xf32> -> vector<8x8x32xf32>
    "tpu.trace_stop"() : () -> ()
    %80 = vector.shape_cast %79 : vector<8x8x32xf32> to vector<2x4x8x32xf32>
    %cst_47 = arith.constant dense<0.000000e+00> : vector<2x8x32xf32>
    %81 = vector.multi_reduction <add>, %80, %cst_47 [1] : vector<2x4x8x32xf32> to vector<2x8x32xf32>
    %82 = vector.shape_cast %81 : vector<2x8x32xf32> to vector<16x32xf32>
    %83 = arith.addf %35, %82 : vector<16x32xf32>
    %c0_48 = arith.constant 0 : index
    %c0_49 = arith.constant 0 : index
    %84 = vector.load %arg13[%c0_48, %c0_49] : memref<1x32xf32, #tpu.memory_space<vmem>>, vector<1x32xf32>
    %85 = arith.mulf %83, %83 : vector<16x32xf32>
    %cst_50 = arith.constant dense<0.000000e+00> : vector<16xf32>
    %86 = vector.multi_reduction <add>, %85, %cst_50 [1] : vector<16x32xf32> to vector<16xf32>
    %87 = vector.shape_cast %86 : vector<16xf32> to vector<16x1xf32>
    %cst_51 = arith.constant 3.200000e+01 : f32
    %88 = vector.broadcast %cst_51 : f32 to vector<16x1xf32>
    %89 = arith.divf %87, %88 : vector<16x1xf32>
    %cst_52 = arith.constant 9.99999997E-7 : f32
    %90 = vector.broadcast %cst_52 : f32 to vector<16x1xf32>
    %91 = arith.addf %89, %90 : vector<16x1xf32>
    %92 = math.rsqrt %91 : vector<16x1xf32>
    %93 = vector.broadcast %92 : vector<16x1xf32> to vector<16x32xf32>
    %94 = arith.mulf %83, %93 : vector<16x32xf32>
    %95 = vector.broadcast %84 : vector<1x32xf32> to vector<16x32xf32>
    %96 = arith.mulf %94, %95 : vector<16x32xf32>
    %c0_53 = arith.constant 0 : index
    %c0_54 = arith.constant 0 : index
    %c0_55 = arith.constant 0 : index
    %97 = vector.load %arg14[%c0_53, %c0_54, %c0_55] : memref<8x32x8xf32, #tpu.memory_space<vmem>>, vector<8x32x8xf32>
    %c0_56 = arith.constant 0 : index
    %c0_57 = arith.constant 0 : index
    %c0_58 = arith.constant 0 : index
    %98 = vector.load %arg15[%c0_56, %c0_57, %c0_58] : memref<8x32x8xf32, #tpu.memory_space<vmem>>, vector<8x32x8xf32>
    %c0_59 = arith.constant 0 : index
    %c0_60 = arith.constant 0 : index
    %c0_61 = arith.constant 0 : index
    %99 = vector.load %arg16[%c0_59, %c0_60, %c0_61] : memref<8x32x8xf32, #tpu.memory_space<vmem>>, vector<8x32x8xf32>
    %c0_62 = arith.constant 0 : index
    %c0_63 = arith.constant 0 : index
    %c0_64 = arith.constant 0 : index
    %100 = vector.load %arg17[%c0_62, %c0_63, %c0_64] : memref<8x8x32xf32, #tpu.memory_space<vmem>>, vector<8x8x32xf32>
    %c0_65 = arith.constant 0 : index
    %c0_66 = arith.constant 0 : index
    %c0_67 = arith.constant 0 : index
    %101 = vector.load %arg3[%c0_65, %c0_66, %c0_67] : memref<8x1x8xf32, #tpu.memory_space<vmem>>, vector<8x1x8xf32>
    %102 = vector.shape_cast %96 : vector<16x32xf32> to vector<2x1x8x32xf32>
    %103 = vector.shape_cast %102 : vector<2x1x8x32xf32> to vector<2x1x8x32xf32>
    %104 = vector.broadcast %103 : vector<2x1x8x32xf32> to vector<2x4x8x32xf32>
    %105 = vector.shape_cast %104 : vector<2x4x8x32xf32> to vector<8x8x32xf32>
    %106 = vector.shape_cast %27 : vector<16x32xf32> to vector<2x1x8x32xf32>
    %107 = vector.shape_cast %106 : vector<2x1x8x32xf32> to vector<2x1x8x32xf32>
    %108 = vector.broadcast %107 : vector<2x1x8x32xf32> to vector<2x4x8x32xf32>
    %109 = vector.shape_cast %108 : vector<2x4x8x32xf32> to vector<8x8x32xf32>
    "tpu.trace_start"() <{level = 10 : i32, message = "zqd,zde->zqe"}> : () -> ()
    %cst_68 = arith.constant dense<0.000000e+00> : vector<8x8x8xf32>
    %110 = tpu.matmul %105, %97, %cst_68 {dimension_numbers = #tpu.dot_dimension_numbers<[2], [1], [1], [2], [0, 0, 0, 1, 1, 2], [0], [0]>} : vector<8x8x32xf32>, vector<8x32x8xf32>, vector<8x8x8xf32> -> vector<8x8x8xf32>
    "tpu.trace_stop"() : () -> ()
    "tpu.trace_start"() <{level = 10 : i32, message = "zmd,zde->zme"}> : () -> ()
    %cst_69 = arith.constant dense<0.000000e+00> : vector<8x8x8xf32>
    %111 = tpu.matmul %109, %98, %cst_69 {dimension_numbers = #tpu.dot_dimension_numbers<[2], [1], [1], [2], [0, 0, 0, 1, 1, 2], [0], [0]>} : vector<8x8x32xf32>, vector<8x32x8xf32>, vector<8x8x8xf32> -> vector<8x8x8xf32>
    %cst_70 = arith.constant dense<0.000000e+00> : vector<8x8x8xf32>
    %112 = tpu.matmul %109, %99, %cst_70 {dimension_numbers = #tpu.dot_dimension_numbers<[2], [1], [1], [2], [0, 0, 0, 1, 1, 2], [0], [0]>} : vector<8x8x32xf32>, vector<8x32x8xf32>, vector<8x8x8xf32> -> vector<8x8x8xf32>
    "tpu.trace_stop"() : () -> ()
    "tpu.trace_start"() <{level = 10 : i32, message = "zqe,zme->zqm"}> : () -> ()
    %cst_71 = arith.constant dense<0.000000e+00> : vector<8x8x8xf32>
    %113 = tpu.matmul %110, %111, %cst_71 {dimension_numbers = #tpu.dot_dimension_numbers<[2], [2], [1], [1], [0, 0, 0, 1, 1, 1], [0], [0]>} : vector<8x8x8xf32>, vector<8x8x8xf32>, vector<8x8x8xf32> -> vector<8x8x8xf32>
    "tpu.trace_stop"() : () -> ()
    %114 = vector.broadcast %101 : vector<8x1x8xf32> to vector<8x8x8xf32>
    %115 = arith.addf %113, %114 : vector<8x8x8xf32>
    %cst_72 = arith.constant dense<0xFF800000> : vector<8x8xf32>
    %116 = vector.multi_reduction <maximumf>, %115, %cst_72 [2] : vector<8x8x8xf32> to vector<8x8xf32>
    %117 = vector.shape_cast %116 : vector<8x8xf32> to vector<8x8x1xf32>
    %118 = vector.broadcast %117 : vector<8x8x1xf32> to vector<8x8x8xf32>
    %119 = arith.subf %115, %118 : vector<8x8x8xf32>
    %120 = math.exp %119 : vector<8x8x8xf32>
    %cst_73 = arith.constant dense<0.000000e+00> : vector<8x8xf32>
    %121 = vector.multi_reduction <add>, %120, %cst_73 [2] : vector<8x8x8xf32> to vector<8x8xf32>
    %122 = vector.shape_cast %121 : vector<8x8xf32> to vector<8x8x1xf32>
    %123 = tpu.reciprocal %122 {approx = true} : vector<8x8x1xf32> -> vector<8x8x1xf32>
    %124 = vector.broadcast %123 : vector<8x8x1xf32> to vector<8x8x8xf32>
    %125 = arith.mulf %120, %124 : vector<8x8x8xf32>
    "tpu.trace_start"() <{level = 10 : i32, message = "zqm,zme->zqe"}> : () -> ()
    %cst_74 = arith.constant dense<0.000000e+00> : vector<8x8x8xf32>
    %126 = tpu.matmul %125, %112, %cst_74 {dimension_numbers = #tpu.dot_dimension_numbers<[2], [1], [1], [2], [0, 0, 0, 1, 1, 2], [0], [0]>} : vector<8x8x8xf32>, vector<8x8x8xf32>, vector<8x8x8xf32> -> vector<8x8x8xf32>
    "tpu.trace_stop"() : () -> ()
    "tpu.trace_start"() <{level = 10 : i32, message = "zqe,zed->zqd"}> : () -> ()
    %cst_75 = arith.constant dense<0.000000e+00> : vector<8x8x32xf32>
    %127 = tpu.matmul %126, %100, %cst_75 {dimension_numbers = #tpu.dot_dimension_numbers<[2], [1], [1], [2], [0, 0, 0, 1, 1, 2], [0], [0]>} : vector<8x8x8xf32>, vector<8x8x32xf32>, vector<8x8x32xf32> -> vector<8x8x32xf32>
    "tpu.trace_stop"() : () -> ()
    %128 = vector.shape_cast %127 : vector<8x8x32xf32> to vector<2x4x8x32xf32>
    %cst_76 = arith.constant dense<0.000000e+00> : vector<2x8x32xf32>
    %129 = vector.multi_reduction <add>, %128, %cst_76 [1] : vector<2x4x8x32xf32> to vector<2x8x32xf32>
    %130 = vector.shape_cast %129 : vector<2x8x32xf32> to vector<16x32xf32>
    %131 = arith.addf %83, %130 : vector<16x32xf32>
    %c0_77 = arith.constant 0 : index
    %c0_78 = arith.constant 0 : index
    %132 = vector.load %arg18[%c0_77, %c0_78] : memref<1x32xf32, #tpu.memory_space<vmem>>, vector<1x32xf32>
    %133 = arith.mulf %131, %131 : vector<16x32xf32>
    %cst_79 = arith.constant dense<0.000000e+00> : vector<16xf32>
    %134 = vector.multi_reduction <add>, %133, %cst_79 [1] : vector<16x32xf32> to vector<16xf32>
    %135 = vector.shape_cast %134 : vector<16xf32> to vector<16x1xf32>
    %cst_80 = arith.constant 3.200000e+01 : f32
    %136 = vector.broadcast %cst_80 : f32 to vector<16x1xf32>
    %137 = arith.divf %135, %136 : vector<16x1xf32>
    %cst_81 = arith.constant 9.99999997E-7 : f32
    %138 = vector.broadcast %cst_81 : f32 to vector<16x1xf32>
    %139 = arith.addf %137, %138 : vector<16x1xf32>
    %140 = math.rsqrt %139 : vector<16x1xf32>
    %141 = vector.broadcast %140 : vector<16x1xf32> to vector<16x32xf32>
    %142 = arith.mulf %131, %141 : vector<16x32xf32>
    %143 = vector.broadcast %132 : vector<1x32xf32> to vector<16x32xf32>
    %144 = arith.mulf %142, %143 : vector<16x32xf32>
    %c0_82 = arith.constant 0 : index
    %c0_83 = arith.constant 0 : index
    %145 = vector.load %arg19[%c0_82, %c0_83] : memref<32x64xf32, #tpu.memory_space<vmem>>, vector<32x64xf32>
    %cst_84 = arith.constant dense<0.000000e+00> : vector<16x64xf32>
    %146 = tpu.matmul %144, %145, %cst_84 {dimension_numbers = #tpu.dot_dimension_numbers<[1], [0], [0], [1], [0, 0, 1, 1], [], []>} : vector<16x32xf32>, vector<32x64xf32>, vector<16x64xf32> -> vector<16x64xf32>
    %cst_85 = arith.constant 0.000000e+00 : f32
    %147 = vector.broadcast %cst_85 : f32 to vector<16x64xf32>
    %148 = arith.maximumf %146, %147 : vector<16x64xf32>
    %c0_86 = arith.constant 0 : index
    %c0_87 = arith.constant 0 : index
    %149 = vector.load %arg20[%c0_86, %c0_87] : memref<64x32xf32, #tpu.memory_space<vmem>>, vector<64x32xf32>
    %cst_88 = arith.constant dense<0.000000e+00> : vector<16x32xf32>
    %150 = tpu.matmul %148, %149, %cst_88 {dimension_numbers = #tpu.dot_dimension_numbers<[1], [0], [0], [1], [0, 0, 1, 1], [], []>} : vector<16x64xf32>, vector<64x32xf32>, vector<16x32xf32> -> vector<16x32xf32>
    %151 = arith.addf %131, %150 : vector<16x32xf32>
    %c0_89 = arith.constant 0 : index
    %c0_90 = arith.constant 0 : index
    %152 = vector.load %arg21[%c0_89, %c0_90] : memref<1x32xf32, #tpu.memory_space<vmem>>, vector<1x32xf32>
    %153 = arith.mulf %151, %151 : vector<16x32xf32>
    %cst_91 = arith.constant dense<0.000000e+00> : vector<16xf32>
    %154 = vector.multi_reduction <add>, %153, %cst_91 [1] : vector<16x32xf32> to vector<16xf32>
    %155 = vector.shape_cast %154 : vector<16xf32> to vector<16x1xf32>
    %cst_92 = arith.constant 3.200000e+01 : f32
    %156 = vector.broadcast %cst_92 : f32 to vector<16x1xf32>
    %157 = arith.divf %155, %156 : vector<16x1xf32>
    %cst_93 = arith.constant 9.99999997E-7 : f32
    %158 = vector.broadcast %cst_93 : f32 to vector<16x1xf32>
    %159 = arith.addf %157, %158 : vector<16x1xf32>
    %160 = math.rsqrt %159 : vector<16x1xf32>
    %161 = vector.broadcast %160 : vector<16x1xf32> to vector<16x32xf32>
    %162 = arith.mulf %151, %161 : vector<16x32xf32>
    %163 = vector.broadcast %152 : vector<1x32xf32> to vector<16x32xf32>
    %164 = arith.mulf %162, %163 : vector<16x32xf32>
    %cst_94 = arith.constant 0.176776692 : f32
    %165 = vector.broadcast %cst_94 : f32 to vector<16x32xf32>
    %166 = arith.mulf %164, %165 : vector<16x32xf32>
    %c0_95 = arith.constant 0 : index
    %c0_96 = arith.constant 0 : index
    %167 = vector.load %arg23[%c0_95, %c0_96] : memref<32x128xf32, #tpu.memory_space<vmem>>, vector<32x128xf32>
    %cst_97 = arith.constant dense<0.000000e+00> : vector<16x128xf32>
    %168 = tpu.matmul %166, %167, %cst_97 {dimension_numbers = #tpu.dot_dimension_numbers<[1], [0], [0], [1], [0, 0, 1, 1], [], []>} : vector<16x32xf32>, vector<32x128xf32>, vector<16x128xf32> -> vector<16x128xf32>
    %cst_98 = arith.constant -1.000000e+02 : f32
    %169 = vector.broadcast %cst_98 : f32 to vector<16x128xf32>
    %170 = arith.maximumf %168, %169 : vector<16x128xf32>
    %c0_99 = arith.constant 0 : index
    %c0_100 = arith.constant 0 : index
    %171 = vector.load %arg24[%c0_99, %c0_100] : memref<16x128xf32, #tpu.memory_space<vmem>>, vector<16x128xf32>
    tpu.vector_store %arg24[%c0_99, %c0_100], %170 {strides = array<i32>} : memref<16x128xf32, #tpu.memory_space<vmem>>, vector<16x128xf32>,
    return
  }
}

</mosaic_0001>

<bundles_post_ra>
// kernel: tpu_custom_call.1
= control target key start
LH: loop header
LB: loop body
LE: loop exit
PB: predicated region body
PF: predicated region fallthrough
CT: control target
= control target key end

     0   :  { %s4638_s0 = inlined_call_operand.vmem [shape: f32[16,48], index: 0, kind: input, shape index: {}]   ;;  %s4639_s1 = inlined_call_operand.vmem [shape: s32[16,1], index: 1, kind: input, shape index: {}]   ;;  %s4640_s2 = inlined_call_operand.vmem [shape: f32[1,8,8], index: 2, kind: input, shape index: {}]   ;;  %s4641_s3 = inlined_call_operand.vmem [shape: f32[8,1,8], index: 3, kind: input, shape index: {}]   ;;  %s4642_s4 = inlined_call_operand.vmem [shape: f32[48,32], index: 4, kind: input, shape index: {}]   ;;  %s4643_s5 = inlined_call_operand.vmem [shape: f32[1,32], index: 5, kind: input, shape index: {}]   ;;  %s4644_s6 = inlined_call_operand.vmem [shape: f32[1,32], index: 6, kind: input, shape index: {}]   ;;  %s4645_s7 = inlined_call_operand.vmem [shape: f32[1,32], index: 7, kind: input, shape index: {}]   ;;  %s4646_s8 = inlined_call_operand.vmem [shape: f32[1,32], index: 8, kind: input, shape index: {}]   ;;  %s4647_s9 = inlined_call_operand.vmem [shape: f32[8,32,8], index: 9, kind: input, shape index: {}]   ;;  %s4648_s10 = inlined_call_operand.vmem [shape: f32[8,32,8], index: 10, kind: input, shape index: {}]   ;;  %s4649_s11 = inlined_call_operand.vmem [shape: f32[8,32,8], index: 11, kind: input, shape index: {}]   ;;  %s4650_s12 = inlined_call_operand.vmem [shape: f32[8,8,32], index: 12, kind: input, shape index: {}]   ;;  %s4651_s13 = inlined_call_operand.vmem [shape: f32[1,32], index: 13, kind: input, shape index: {}]   ;;  %s4652_s14 = inlined_call_operand.vmem [shape: f32[8,32,8], index: 14, kind: input, shape index: {}]   ;;  %s4653_s15 = inlined_call_operand.vmem [shape: f32[8,32,8], index: 15, kind: input, shape index: {}]   ;;  %s4654_s16 = inlined_call_operand.vmem [shape: f32[8,32,8], index: 16, kind: input, shape index: {}]   ;;  %s4655_s17 = inlined_call_operand.vmem [shape: f32[8,8,32], index: 17, kind: input, shape index: {}]   ;;  %s4656_s18 = inlined_call_operand.vmem [shape: f32[1,32], index: 18, kind: input, shape index: {}]   ;;  %s4657_s19 = inlined_call_operand.vmem [shape: f32[32,64], index: 19, kind: input, shape index: {}]   ;;  %s4658_s20 = inlined_call_operand.vmem [shape: f32[64,32], index: 20, kind: input, shape index: {}]   ;;  %s4659_s21 = inlined_call_operand.vmem [shape: f32[1,32], index: 21, kind: input, shape index: {}]   ;;  %s4660_s22 = inlined_call_operand.vmem [shape: f32[128,32], index: 22, kind: input, shape index: {}]   ;;  %s4661_s23 = inlined_call_operand.vmem [shape: f32[32,128], index: 23, kind: input, shape index: {}]   ;;  %s4662_s24 = inlined_call_operand.hbm [shape: f32[16,128], index: 24, kind: output, shape index: {}]  }
   0x1   :  { %4667 = sst [smem:[#allocation5_spill]] %s4638_s0 }
   0x2   :  { %4668 = sst [smem:[#allocation6_spill]] %s4639_s1 }
   0x3   :  { %4669 = sst [smem:[#allocation7_spill]] %s4640_s2 }
   0x4   :  { %4670 = sst [smem:[#allocation8_spill]] %s4641_s3 }
   0x5   :  { %4671 = sst [smem:[#allocation9_spill]] %s4642_s4 }
   0x6   :  { %4672 = sst [smem:[#allocation10_spill]] %s4643_s5 }
   0x7   :  { %4673 = sst [smem:[#allocation11_spill]] %s4644_s6 }
   0x8   :  { %4674 = sst [smem:[#allocation12_spill]] %s4645_s7 }
   0x9   :  { %4675 = sst [smem:[#allocation13_spill]] %s4646_s8 }
   0xa   :  { %s4676_s27 = sld [smem:[#allocation6_spill]]  ;;  %v215_v1 = vld [vmem:[%s4660_s22 + $0x78] sm:$0xff]  ;;  %v3369_v2 = vmov 0   ;;  %v214_v3 = vld [vmem:[%s4660_s22 + $0x70] sm:$0xff]  ;;  %v213_v4 = vld [vmem:[%s4660_s22 + $0x68] sm:$0xff] }
   0xb   :  { %3241 = vset.pattern.permute.xlu0 %v3369_v2  ;;  %216 = vmatpush.msra.mxu1 %v215_v1  ;;  %v212_v5 = vld [vmem:[%s4660_s22 + $0x60] sm:$0xff]  ;;  %v211_v7 = vld [vmem:[%s4660_s22 + $0x58] sm:$0xff]  ;;  %v210_v8 = vld [vmem:[%s4660_s22 + $0x50] sm:$0xff] }
   0xc   :  { %v209_v9 = vld [vmem:[%s4660_s22 + $0x48] sm:$0xff] }
   0xd   :  { %217 = vmatpush.msra.mxu1 %v214_v3 }
   0xf   :  { %218 = vmatpush.msra.mxu1 %v213_v4 }
  0x10   :  { %v186_v0 = vld [vmem:[%s4676_s27] sm:$0xff]  ;;  %v187_v6 = vld [vmem:[%s4676_s27 + $0x8] sm:$0xff] }
  0x11   :  { %189 = vperm.xlu0 %3241, %v186_v0   ;;  %219 = vmatpush.msra.mxu1 %v212_v5 }
  0x13   :  { %220 = vmatpush.msra.mxu1 %v211_v7 }
  0x19   :  { %192 = vperm.xlu0 %3241, %v187_v6  }
  0x1a   :  { %29 = vsyncpa [#allocation3], 0  ;;  %221 = vmatpush.msra.mxu1 %v210_v8  ;;  %v208_v10 = vld [vmem:[%s4660_s22 + $0x40] sm:$0xff]  ;;  %v207_v11 = vld [vmem:[%s4660_s22 + $0x38] sm:$0xff]  ;;  %v184_v19 = vlaneseq  ;;  %v3370_v22 = vmov 1.0   ;;  %vm120_vm2 = vcmask 261120  }
  0x1b   :  { %v206_v12 = vld [vmem:[%s4660_s22 + $0x30] sm:$0xff]  ;;  %v205_v13 = vld [vmem:[%s4660_s22 + $0x28] sm:$0xff]  ;;  %v204_v14 = vld [vmem:[%s4660_s22 + $0x20] sm:$0xff]  ;;  %v3371_v30 = vmov 32.0   ;;  %s4677_s7 = sld [smem:[#allocation9_spill]]  ;;  %vm90_vm3 = vcmask 392192  }
  0x1c   :  { %222 = vmatpush.msra.mxu1 %v209_v9  ;;  %v203_v15 = vld [vmem:[%s4660_s22 + $0x18] sm:$0xff]  ;;  %v202_v16 = vld [vmem:[%s4660_s22 + $0x10] sm:$0xff]  ;;  %v201_v17 = vld [vmem:[%s4660_s22 + $0x8] sm:$0xff]  ;;  %v185_v20 = vand.u32 127, %v184_v19  ;;  %3257 = vrcp.f32 %v3371_v30  ;;  %s4678_s29 = sld [smem:[#allocation5_spill]]  ;;  %vm870_vm11 = vcmask 64512  }
  0x1d   :  { %v200_v18 = vld [vmem:[%s4660_s22] sm:$0xff]  ;;  %v282_v41 = vld [vmem:[%s4647_s9 + $0x18] sm:$0xff]  ;;  %v281_v44 = vld [vmem:[%s4647_s9 + $0x10] sm:$0xff]  ;;  %s4679_s8 = sld [smem:[#allocation13_spill]]  ;;  %s3374_s0 = smov 8  }
  0x1e   :  { %223 = vmatpush.msra.mxu1 %v208_v10  ;;  %v286_v42 = vld [vmem:[%s4647_s9 + $0x38] sm:$0xff]  ;;  %399 = vmatpush.msra.mxu2 %v282_v41  ;;  %v285_v45 = vld [vmem:[%s4647_s9 + $0x30] sm:$0xff]  ;;  %v280_v48 = vld [vmem:[%s4647_s9 + $0x8] sm:$0xff]  ;;  %s4684_s28 = sld [smem:[#allocation11_spill]] }
  0x1f   :  { %v350_v43 = vld [vmem:[%s4649_s11 + $0x38] sm:$0xff]  ;;  %419 = vmatpush.msra.mxu3 %v286_v42  ;;  %v349_v46 = vld [vmem:[%s4649_s11 + $0x30] sm:$0xff]  ;;  %v284_v49 = vld [vmem:[%s4647_s9 + $0x28] sm:$0xff]  ;;  %s4688_s25 = sld [smem:[#allocation8_spill]] }
  0x20   :  { %224 = vmatpush.msra.mxu1 %v207_v11  ;;  %400 = vmatpush.msra.mxu2 %v281_v44  ;;  %v348_v50 = vld [vmem:[%s4649_s11 + $0x28] sm:$0xff]  ;;  %v279_v51 = vld [vmem:[%s4647_s9] sm:$0xff]  ;;  %v290_v56 = vld [vmem:[%s4647_s9 + $0x58] sm:$0xff] }
  0x21   :  { %v85_v31 = vld [vmem:[%s4677_s7 + $0x28] sm:$0xff]  ;;  %v84_v32 = vld [vmem:[%s4677_s7 + $0x20] sm:$0xff]  ;;  %v83_v34 = vld [vmem:[%s4677_s7 + $0x18] sm:$0xff]  ;;  %420 = vmatpush.msra.mxu3 %v285_v45 }
  0x22   :  { %225 = vmatpush.msra.mxu1 %v206_v12  ;;  %107 = vmatpush.msra.mxu0 %v85_v31  ;;  %v3258_v33 = vpop.eup %3257  ;;  %v82_v35 = vld [vmem:[%s4677_s7 + $0x10] sm:$0xff]  ;;  %v81_v37 = vld [vmem:[%s4677_s7 + $0x8] sm:$0xff]  ;;  %v80_v38 = vld [vmem:[%s4677_s7] sm:$0xff] }
  0x23   :  { %v128_v36 = vmul.f32 32.0, %v3258_v33  ;;  %v78_v40 = vld [vmem:[%s4678_s29] sm:$0xff]  ;;  %401 = vmatpush.msra.mxu2 %v280_v48  ;;  %421 = vmatpush.msra.mxu3 %v284_v49  ;;  %v79_v55 = vld [vmem:[%s4678_s29 + $0x8] sm:$0xff]  ;;  %vm132_vm4 = vweird.f32 %v3258_v33  ;;  %v294_v57 = vld [vmem:[%s4647_s9 + $0x78] sm:$0xff]  ;;  %s4681_s29 = sld [smem:[#allocation10_spill]] }
  0x24   :  { %226 = vmatpush.msra.mxu1 %v205_v13  ;;  %108 = vmatpush.msra.mxu0 %v84_v32  ;;  %v283_v52 = vld [vmem:[%s4647_s9 + $0x20] sm:$0xff]  ;;  %v306_v58 = vld [vmem:[%s4647_s9 + $0xd8] sm:$0xff]  ;;  %v289_v61 = vld [vmem:[%s4647_s9 + $0x50] sm:$0xff] }
  0x25   :  { %v129_v39 = vsub.f32 1.0, %v128_v36  ;;  %v347_v53 = vld [vmem:[%s4649_s11 + $0x20] sm:$0xff]  ;;  %402 = vmatpush.msra.mxu2 %v279_v51  ;;  %422 = vmatpush.msra.mxu3 %v283_v52  ;;  %v366_v59 = vld [vmem:[%s4649_s11 + $0xb8] sm:$0xff]  ;;  %v293_v62 = vld [vmem:[%s4647_s9 + $0x70] sm:$0xff] }
  0x26   :  { %227 = vmatpush.msra.mxu1 %v204_v14  ;;  %109 = vmatpush.msra.mxu0 %v83_v34  ;;  %v305_v63 = vld [vmem:[%s4647_s9 + $0xd0] sm:$0xff]  ;;  %v288_v2 = vld [vmem:[%s4647_s9 + $0x48] sm:$0xff]  ;;  %v287_v7 = vld [vmem:[%s4647_s9 + $0x40] sm:$0xff] }
  0x27   :  { %v130_v47 = vmul.f32 %v3258_v33, %v129_v39  ;;  %439 = vmatpush.msrb.mxu2 %v290_v56  ;;  %459 = vmatpush.msrb.mxu3 %v294_v57  ;;  %v365_v0 = vld [vmem:[%s4649_s11 + $0xb0] sm:$0xff]  ;;  %v292_v3 = vld [vmem:[%s4647_s9 + $0x68] sm:$0xff]  ;;  %v291_v8 = vld [vmem:[%s4647_s9 + $0x60] sm:$0xff] }
  0x28   :  { %228 = vmatpush.msra.mxu1 %v203_v15  ;;  %110 = vmatpush.msra.mxu0 %v82_v35  ;;  %v304_v4 = vld [vmem:[%s4647_s9 + $0xc8] sm:$0xff]  ;;  %v303_v9 = vld [vmem:[%s4647_s9 + $0xc0] sm:$0xff]  ;;  %v318_v12 = vld [vmem:[%s4648_s10 + $0x38] sm:$0xff] }
  0x29   :  { %v131_v54 = vadd.f32 %v3258_v33, %v130_v47  ;;  %440 = vmatpush.msrb.mxu2 %v289_v61  ;;  %460 = vmatpush.msrb.mxu3 %v293_v62  ;;  %v364_v6 = vld [vmem:[%s4649_s11 + $0xa8] sm:$0xff]  ;;  %v363_v10 = vld [vmem:[%s4649_s11 + $0xa0] sm:$0xff]  ;;  %v317_v13 = vld [vmem:[%s4648_s10 + $0x30] sm:$0xff] }
  0x2a   :  { %229 = vmatpush.msra.mxu1 %v202_v16  ;;  %111 = vmatpush.msra.mxu0 %v81_v37  ;;  %v316_v14 = vld [vmem:[%s4648_s10 + $0x28] sm:$0xff]  ;;  %v315_v16 = vld [vmem:[%s4648_s10 + $0x20] sm:$0xff]  ;;  %v298_v35 = vld [vmem:[%s4647_s9 + $0x98] sm:$0xff] }
  0x2b   :  { %v3638_v60 = vsel %vm132_vm4, %v3258_v33, %v131_v54  ;;  %441 = vmatpush.msrb.mxu2 %v288_v2  ;;  %461 = vmatpush.msrb.mxu3 %v292_v3  ;;  %v302_v37 = vld [vmem:[%s4647_s9 + $0xb8] sm:$0xff]  ;;  %v296_v41 = vld [vmem:[%s4647_s9 + $0x88] sm:$0xff]  ;;  %v295_v45 = vld [vmem:[%s4647_s9 + $0x80] sm:$0xff] }
  0x2c   :  { %230 = vmatpush.msra.mxu1 %v201_v17  ;;  %112 = vmatpush.msra.mxu0 %v80_v38  ;;  %v297_v38 = vld [vmem:[%s4647_s9 + $0x90] sm:$0xff]  ;;  %v299_v47 = vld [vmem:[%s4647_s9 + $0xa0] sm:$0xff]  ;;  %v310_v48 = vld [vmem:[%s4647_s9 + $0xf8] sm:$0xff] }
  0x2d   :  { %3111 = vmatmul.msk.f32.vlgmr.msra.gmra.mxu0 %vm90_vm3, %v78_v40  ;;  %442 = vmatpush.msrb.mxu2 %v287_v7  ;;  %v301_v40 = vld [vmem:[%s4647_s9 + $0xb0] sm:$0xff]  ;;  %v314_v49 = vld [vmem:[%s4648_s10 + $0x18] sm:$0xff]  ;;  %v308_v54 = vld [vmem:[%s4647_s9 + $0xe8] sm:$0xff] }
  0x2e   :  { %231 = vmatpush.msra.mxu1 %v200_v18  ;;  %522 = vmatpush.msrb.mxu0 %v306_v58  ;;  %v309_v51 = vld [vmem:[%s4647_s9 + $0xf0] sm:$0xff]  ;;  %v328_v56 = vld [vmem:[%s4648_s10 + $0x88] sm:$0xff]  ;;  %v307_v57 = vld [vmem:[%s4647_s9 + $0xe0] sm:$0xff] }
  0x2f   :  { %462 = vmatpush.msrb.mxu3 %v291_v8  ;;  %v313_v52 = vld [vmem:[%s4648_s10 + $0x10] sm:$0xff]  ;;  %v311_v58 = vld [vmem:[%s4648_s10] sm:$0xff]  ;;  %v322_v61 = vld [vmem:[%s4648_s10 + $0x58] sm:$0xff] }
  0x30   :  { %742 = vmatpush.msrb.mxu1 %v350_v43  ;;  %523 = vmatpush.msrb.mxu0 %v305_v63  ;;  %v300_v43 = vld [vmem:[%s4647_s9 + $0xa8] sm:$0xff]  ;;  %v326_v62 = vld [vmem:[%s4648_s10 + $0x78] sm:$0xff]  ;;  %v345_v2 = vld [vmem:[%s4649_s11 + $0x10] sm:$0xff]  ;;  %s4680_s9 = sld [smem:[#allocation7_spill]] }
  0x31   :  { %v346_v63 = vld [vmem:[%s4649_s11 + $0x18] sm:$0xff]  ;;  %v320_v3 = vld [vmem:[%s4648_s10 + $0x48] sm:$0xff]  ;;  %v323_v7 = vld [vmem:[%s4648_s10 + $0x60] sm:$0xff] }
  0x32   :  { %743 = vmatpush.msrb.mxu1 %v349_v46  ;;  %524 = vmatpush.msrb.mxu0 %v304_v4  ;;  %v324_v4 = vld [vmem:[%s4648_s10 + $0x68] sm:$0xff]  ;;  %v334_v8 = vld [vmem:[%s4648_s10 + $0xb8] sm:$0xff] }
  0x34   :  { %744 = vmatpush.msrb.mxu1 %v348_v50  ;;  %525 = vmatpush.msrb.mxu0 %v303_v9  ;;  %v330_v50 = vld [vmem:[%s4648_s10 + $0x98] sm:$0xff] }
  0x35   :  { %3112 = vmatmul.msk.f32.gmra.mxu0 %vm90_vm3, %v79_v55  ;;  %v312_v55 = vld [vmem:[%s4648_s10 + $0x8] sm:$0xff]  ;;  %v338_v9 = vld [vmem:[%s4648_s10 + $0xd8] sm:$0xff] }
  0x36   :  { %745 = vmatpush.msrb.mxu1 %v347_v53  ;;  %582 = vmatpush.msra.mxu0 %v318_v12  ;;  %v329_v53 = vld [vmem:[%s4648_s10 + $0x90] sm:$0xff] }
  0x37   :  { %v333_v12 = vld [vmem:[%s4648_s10 + $0xb0] sm:$0xff] }
  0x38   :  { %583 = vmatpush.msra.mxu0 %v317_v13  ;;  %v337_v13 = vld [vmem:[%s4648_s10 + $0xd0] sm:$0xff] }
  0x3a   :  { %584 = vmatpush.msra.mxu0 %v316_v14  ;;  %v361_v14 = vld [vmem:[%s4649_s11 + $0x90] sm:$0xff] }
  0x3c   :  { %585 = vmatpush.msra.mxu0 %v315_v16  ;;  %v336_v16 = vld [vmem:[%s4648_s10 + $0xc8] sm:$0xff] }
  0x83   :  { %v190_v21 = vpop.permute.xlu0 %189 }
  0x84   :  { %vm194_vm0 = vcmp.eq.s32.totalorder %v185_v20, %v190_v21 }
  0x85   :  { %3115 = vmatmul.msk.f32.vlgmr.msra.gmra.mxu1 %vm194_vm0, %v3370_v22 }
  0x86   :  { %822 = vmatpush.msra.mxu1 %v366_v59  ;;  %v327_v59 = vld [vmem:[%s4648_s10 + $0x80] sm:$0xff] }
  0x88   :  { %823 = vmatpush.msra.mxu1 %v365_v0  ;;  %v321_v0 = vld [vmem:[%s4648_s10 + $0x50] sm:$0xff] }
  0x8a   :  { %824 = vmatpush.msra.mxu1 %v364_v6  ;;  %v344_v6 = vld [vmem:[%s4649_s11 + $0x8] sm:$0xff] }
  0x8b   :  { %v193_v23 = vpop.permute.xlu0 %192 }
  0x8c   :  { %vm195_vm1 = vcmp.eq.s32.totalorder %v185_v20, %v193_v23  ;;  %825 = vmatpush.msra.mxu1 %v363_v10  ;;  %v343_v10 = vld [vmem:[%s4649_s11] sm:$0xff] }
  0x8d   :  { %3116 = vmatmul.msk.f32.gmra.mxu1 %vm195_vm1, %v3370_v22 }
 0x102   :  { %v3554_v24 = vpop.f32.mrf.mxu1 }
 0x103   :  { %v240_v25 = vmul.f32 %v3554_v24, %v3554_v24 }
 0x105   :  { %v242_v26 = vsel %vm120_vm2, %v240_v25, 0.0 }
 0x106   :  { %243 = vadd.xlane.f32.xlu1 %v242_v26 }
 0x10a   :  { %v3559_v27 = vpop.f32.mrf.mxu1 }
 0x10b   :  { %v241_v28 = vmul.f32 %v3559_v27, %v3559_v27 }
 0x10d   :  { %v245_v29 = vsel %vm120_vm2, %v241_v28, 0.0 }
 0x10e   :  { %246 = vadd.xlane.f32.xlu1 %v245_v29  ;;  %v3242_v29 = vld [vmem:[%s4679_s8] ss:$0 sm:$0xff] }
 0x179   :  { %v244_v1 = vpop.xlane.xlu1 %243 }
 0x17a   :  { %v248_v5 = vmul.f32 %v244_v1, %v3638_v60  ;;  %v325_v1 = vld [vmem:[%s4648_s10 + $0x70] sm:$0xff] }
 0x17c   :  { %v250_v11 = vadd.f32 1e-06, %v248_v5  ;;  %v319_v5 = vld [vmem:[%s4648_s10 + $0x40] sm:$0xff] }
 0x17e   :  { %3259 = vrsqrt.f32 %v250_v11  ;;  %vm258_vm6 = vweird.f32 %v250_v11 }
 0x181   :  { %v247_v15 = vpop.xlane.xlu1 %246 }
 0x182   :  { %v249_v17 = vmul.f32 %v247_v15, %v3638_v60  ;;  %v332_v15 = vld [vmem:[%s4648_s10 + $0xa8] sm:$0xff] }
 0x184   :  { %v3260_v18 = vpop.eup %3259  ;;  %v251_v19 = vadd.f32 1e-06, %v249_v17  ;;  %v360_v17 = vld [vmem:[%s4649_s11 + $0x88] sm:$0xff] }
 0x185   :  { %v253_v20 = vmul.f32 %v3260_v18, %v250_v11  ;;  %vm259_vm5 = vweird.f32 %v3260_v18  ;;  %v362_v11 = vld [vmem:[%s4649_s11 + $0x98] sm:$0xff] }
 0x186   :  { %3261 = vrsqrt.f32 %v251_v19  ;;  %vm260_vm7 = vmor %vm258_vm6, %vm259_vm5  ;;  %vm268_vm9 = vweird.f32 %v251_v19 }
 0x187   :  { %v254_v21 = vmul.f32 %v3260_v18, %v253_v20  ;;  %v342_v20 = vld [vmem:[%s4648_s10 + $0xf8] sm:$0xff] }
 0x189   :  { %v255_v22 = vmul.f32 0.5, %v254_v21  ;;  %v359_v21 = vld [vmem:[%s4649_s11 + $0x80] sm:$0xff] }
 0x18b   :  { %v256_v23 = vsub.f32 1.5, %v255_v22  ;;  %v354_v22 = vld [vmem:[%s4649_s11 + $0x58] sm:$0xff] }
 0x18c   :  { %v3262_v25 = vpop.eup %3261 }
 0x18d   :  { %v257_v26 = vmul.f32 %v3260_v18, %v256_v23  ;;  %v263_v28 = vmul.f32 %v3262_v25, %v251_v19  ;;  %vm269_vm8 = vweird.f32 %v3262_v25  ;;  %v335_v19 = vld [vmem:[%s4648_s10 + $0xc0] sm:$0xff]  ;;  %v341_v23 = vld [vmem:[%s4648_s10 + $0xf0] sm:$0xff] }
 0x18e   :  { %vm270_vm10 = vmor %vm268_vm9, %vm269_vm8 }
 0x18f   :  { %v261_v30 = vsel %vm260_vm7, %v3260_v18, %v257_v26  ;;  %v264_v31 = vmul.f32 %v3262_v25, %v263_v28  ;;  %v331_v18 = vld [vmem:[%s4648_s10 + $0xa0] sm:$0xff]  ;;  %v340_v26 = vld [vmem:[%s4648_s10 + $0xe8] sm:$0xff] }
 0x190   :  { %v272_v32 = vmul.f32 %v261_v30, %v3554_v24  ;;  %v352_v28 = vld [vmem:[%s4649_s11 + $0x48] sm:$0xff]  ;;  %v351_v30 = vld [vmem:[%s4649_s11 + $0x40] sm:$0xff] }
 0x191   :  { %v265_v33 = vmul.f32 0.5, %v264_v31  ;;  %v358_v31 = vld [vmem:[%s4649_s11 + $0x78] sm:$0xff] }
 0x192   :  { %v3694_v34 = vmul.f32 %v3242_v29, %v272_v32  ;;  %v370_v32 = vld [vmem:[%s4649_s11 + $0xd8] sm:$0xff] }
 0x193   :  { %v266_v36 = vsub.f32 1.5, %v265_v33  ;;  %v357_v33 = vld [vmem:[%s4649_s11 + $0x70] sm:$0xff] }
 0x194   :  { %3117 = vmatmul.msk.f32.vlgmr.msra.gmra.mxu2 %vm120_vm2, %v3694_v34  ;;  %3118 = vmatmul.msk.f32.vlgmr.msra.gmra.mxu3 %vm120_vm2, %v3694_v34 }
 0x195   :  { %v267_v39 = vmul.f32 %v3262_v25, %v266_v36  ;;  %3134 = vmatmul.msk.f32.vlgmr.msrb.gmra.mxu1 %vm120_vm2, %v3694_v34  ;;  %482 = vmatpush.msra.mxu2 %v298_v35  ;;  %v369_v35 = vld [vmem:[%s4649_s11 + $0xd0] sm:$0xff]  ;;  %v356_v36 = vld [vmem:[%s4649_s11 + $0x68] sm:$0xff] }
 0x196   :  { %502 = vmatpush.msra.mxu3 %v302_v37  ;;  %v368_v37 = vld [vmem:[%s4649_s11 + $0xc8] sm:$0xff] }
 0x197   :  { %v271_v42 = vsel %vm270_vm10, %v3262_v25, %v267_v39  ;;  %483 = vmatpush.msra.mxu2 %v297_v38  ;;  %v353_v25 = vld [vmem:[%s4649_s11 + $0x50] sm:$0xff]  ;;  %v355_v38 = vld [vmem:[%s4649_s11 + $0x60] sm:$0xff]  ;;  %v374_v39 = vld [vmem:[%s4649_s11 + $0xf8] sm:$0xff] }
 0x198   :  { %v273_v44 = vmul.f32 %v271_v42, %v3559_v27  ;;  %503 = vmatpush.msra.mxu3 %v301_v40  ;;  %v367_v40 = vld [vmem:[%s4649_s11 + $0xc0] sm:$0xff]  ;;  %v372_v42 = vld [vmem:[%s4649_s11 + $0xe8] sm:$0xff] }
 0x199   :  { %484 = vmatpush.msra.mxu2 %v296_v41  ;;  %v373_v41 = vld [vmem:[%s4649_s11 + $0xf0] sm:$0xff] }
 0x19a   :  { %v3724_v46 = vmul.f32 %v3242_v29, %v273_v44  ;;  %504 = vmatpush.msra.mxu3 %v300_v43  ;;  %v339_v29 = vld [vmem:[%s4648_s10 + $0xe0] sm:$0xff]  ;;  %v3939_v44 = vpop.f32.mrf.mxu0 }
 0x19b   :  { %485 = vmatpush.msra.mxu2 %v295_v45  ;;  %v371_v43 = vld [vmem:[%s4649_s11 + $0xe0] sm:$0xff] }
 0x19c   :  { %3119 = vmatmul.msk.f32.vlgmr.msrb.gmra.mxu2 %vm120_vm2, %v3694_v34  ;;  %3120 = vmatmul.msk.f32.vlgmr.msrb.gmra.mxu3 %vm120_vm2, %v3694_v34 }
 0x19d   :  { %3123 = vmatmul.msk.f32.vlgmr.msrb.gmra.mxu0 %vm120_vm2, %v3724_v46  ;;  %3138 = vmatmul.msk.f32.vlgmr.msra.gmra.mxu1 %vm120_vm2, %v3724_v46 }
 0x19e   :  { %505 = vmatpush.msra.mxu3 %v299_v47  ;;  %542 = vmatpush.msrb.mxu2 %v310_v48 }
 0x19f   :  { %642 = vmatpush.msrb.mxu0 %v330_v50 }
 0x1a0   :  { %562 = vmatpush.msrb.mxu3 %v314_v49  ;;  %543 = vmatpush.msrb.mxu2 %v309_v51 }
 0x1a1   :  { %643 = vmatpush.msrb.mxu0 %v329_v53 }
 0x1a2   :  { %563 = vmatpush.msrb.mxu3 %v313_v52  ;;  %544 = vmatpush.msrb.mxu2 %v308_v54  ;;  %v3941_v45 = vpop.f32.mrf.mxu0 }
 0x1a3   :  { %644 = vmatpush.msrb.mxu0 %v328_v56 }
 0x1a4   :  { %564 = vmatpush.msrb.mxu3 %v312_v55  ;;  %3121 = vmatmul.msk.f32.vlgmr.msra.gmra.mxu2 %vm120_vm2, %v3724_v46 }
 0x1a5   :  { %3122 = vmatmul.msk.f32.vlgmr.msra.gmra.mxu3 %vm120_vm2, %v3724_v46  ;;  %3126 = vmatmul.msk.f32.vlgmr.msra.gmra.mxu0 %vm120_vm2, %v3694_v34 }
 0x1a6   :  { %545 = vmatpush.msrb.mxu2 %v307_v57  ;;  %565 = vmatpush.msrb.mxu3 %v311_v58 }
 0x1a7   :  { %645 = vmatpush.msrb.mxu0 %v327_v59 }
 0x1a8   :  { %602 = vmatpush.msra.mxu2 %v322_v61  ;;  %622 = vmatpush.msra.mxu3 %v326_v62 }
 0x1a9   :  { %722 = vmatpush.msra.mxu0 %v346_v63 }
 0x1aa   :  { %603 = vmatpush.msra.mxu2 %v321_v0  ;;  %623 = vmatpush.msra.mxu3 %v325_v1 }
 0x1ab   :  { %723 = vmatpush.msra.mxu0 %v345_v2 }
 0x1ac   :  { %604 = vmatpush.msra.mxu2 %v320_v3  ;;  %624 = vmatpush.msra.mxu3 %v324_v4 }
 0x1ad   :  { %3124 = vmatmul.msk.f32.vlgmr.msrb.gmra.mxu2 %vm120_vm2, %v3724_v46  ;;  %3125 = vmatmul.msk.f32.vlgmr.msrb.gmra.mxu3 %vm120_vm2, %v3694_v34 }
 0x1ae   :  { %3129 = vmatmul.msk.f32.vlgmr.msrb.gmra.mxu0 %vm120_vm2, %v3724_v46  ;;  %605 = vmatpush.msra.mxu2 %v319_v5 }
 0x1af   :  { %724 = vmatpush.msra.mxu0 %v344_v6  ;;  %625 = vmatpush.msra.mxu3 %v323_v7  ;;  %v383_v6 = vld [vmem:[%s4680_s9] sm:$0xff]  ;;  %s3099_s9 = sshll.u32 %s4662_s24, 4  ;;  %s3100_s9 = int_to_ptr.hbm [resolvable:$true] %s3099_s9 }
 0x1b0   :  { %682 = vmatpush.msrb.mxu2 %v338_v9 }
 0x1b1   :  { %662 = vmatpush.msrb.mxu3 %v334_v8  ;;  %725 = vmatpush.msra.mxu0 %v343_v10 }
 0x1b2   :  { %683 = vmatpush.msrb.mxu2 %v337_v13 }
 0x1b3   :  { %802 = vmatpush.msrb.mxu0 %v362_v11  ;;  %663 = vmatpush.msrb.mxu3 %v333_v12 }
 0x1b4   :  { %684 = vmatpush.msrb.mxu2 %v336_v16 }
 0x1b5   :  { %803 = vmatpush.msrb.mxu0 %v361_v14  ;;  %664 = vmatpush.msrb.mxu3 %v332_v15 }
 0x1b6   :  { %3127 = vmatmul.msk.f32.vlgmr.msra.gmra.mxu2 %vm120_vm2, %v3694_v34  ;;  %3128 = vmatmul.msk.f32.vlgmr.msra.gmra.mxu3 %vm120_vm2, %v3694_v34 }
 0x1b7   :  { %3133 = vmatmul.msk.f32.vlgmr.msra.gmra.mxu0 %vm120_vm2, %v3694_v34  ;;  %665 = vmatpush.msrb.mxu3 %v331_v18 }
 0x1b8   :  { %804 = vmatpush.msrb.mxu0 %v360_v17  ;;  %685 = vmatpush.msrb.mxu2 %v335_v19 }
 0x1b9   :  { %702 = vmatpush.msra.mxu3 %v342_v20 }
 0x1ba   :  { %805 = vmatpush.msrb.mxu0 %v359_v21  ;;  %762 = vmatpush.msra.mxu2 %v354_v22 }
 0x1bb   :  { %703 = vmatpush.msra.mxu3 %v341_v23 }
 0x1bc   :  { %763 = vmatpush.msra.mxu2 %v353_v25 }
 0x1bd   :  { %704 = vmatpush.msra.mxu3 %v340_v26 }
 0x1be   :  { %3130 = vmatmul.msk.f32.vlgmr.msrb.gmra.mxu3 %vm120_vm2, %v3724_v46  ;;  %3131 = vmatmul.msk.f32.vlgmr.msrb.gmra.mxu2 %vm120_vm2, %v3724_v46 }
 0x1bf   :  { %3137 = vmatmul.msk.f32.vlgmr.msrb.gmra.mxu0 %vm120_vm2, %v3724_v46  ;;  %764 = vmatpush.msra.mxu2 %v352_v28 }
 0x1c0   :  { %705 = vmatpush.msra.mxu3 %v339_v29 }
 0x1c1   :  { %765 = vmatpush.msra.mxu2 %v351_v30 }
 0x1c2   :  { %782 = vmatpush.msrb.mxu3 %v358_v31 }
 0x1c3   :  { %842 = vmatpush.msrb.mxu2 %v370_v32 }
 0x1c4   :  { %783 = vmatpush.msrb.mxu3 %v357_v33 }
 0x1c5   :  { %843 = vmatpush.msrb.mxu2 %v369_v35 }
 0x1c6   :  { %784 = vmatpush.msrb.mxu3 %v356_v36  ;;  %3135 = vmatmul.msk.f32.vlgmr.msra.gmra.mxu2 %vm120_vm2, %v3694_v34 }
 0x1c7   :  { %3132 = vmatmul.msk.f32.vlgmr.msra.gmra.mxu3 %vm120_vm2, %v3724_v46  ;;  %844 = vmatpush.msrb.mxu2 %v368_v37 }
 0x1c8   :  { %785 = vmatpush.msrb.mxu3 %v355_v38 }
 0x1c9   :  { %845 = vmatpush.msrb.mxu2 %v367_v40 }
 0x1ca   :  { %862 = vmatpush.msra.mxu3 %v374_v39 }
 0x1cc   :  { %863 = vmatpush.msra.mxu3 %v373_v41 }
 0x1ce   :  { %864 = vmatpush.msra.mxu3 %v372_v42  ;;  %3139 = vmatmul.msk.f32.vlgmr.msrb.gmra.mxu2 %vm120_vm2, %v3724_v46 }
 0x1cf   :  { %3136 = vmatmul.msk.f32.vlgmr.msrb.gmra.mxu3 %vm120_vm2, %v3694_v34 }
 0x1d0   :  { %865 = vmatpush.msra.mxu3 %v371_v43 }
 0x1d7   :  { %3140 = vmatmul.msk.f32.vlgmr.msra.gmra.mxu3 %vm120_vm2, %v3724_v46 }
 0x212   :  { %v747_v59 = vpop.f32.mrf.mxu1 }
 0x217   :  { %v404_v47 = vpop.f32.mrf.mxu2  ;;  %v424_v48 = vpop.f32.mrf.mxu3 }
 0x21a   :  { %v527_v49 = vpop.f32.mrf.mxu0  ;;  %v827_v0 = vpop.f32.mrf.mxu1 }
 0x21f   :  { %v444_v50 = vpop.f32.mrf.mxu2  ;;  %v464_v51 = vpop.f32.mrf.mxu3 }
 0x222   :  { %v587_v52 = vpop.f32.mrf.mxu0 }
 0x223   :  { %3143 = vmatpush.xpose.msk.msrb.mxu1 %vm870_vm11, %v587_v52 }
 0x226   :  { %3144 = vmatmul.msk.f32.vlgmr.msrb.gmra.mxu1 %vm870_vm11, %v424_v48 }
 0x227   :  { %v487_v34 = vpop.f32.mrf.mxu2 }
 0x228   :  { %v507_v53 = vpop.f32.mrf.mxu3 }
 0x22b   :  { %v647_v54 = vpop.f32.mrf.mxu0 }
 0x230   :  { %v547_v55 = vpop.f32.mrf.mxu2  ;;  %v567_v46 = vpop.f32.mrf.mxu3 }
 0x231   :  { %3141 = vmatpush.xpose.msk.msra.mxu0 %vm870_vm11, %v567_v46 }
 0x234   :  { %v727_v56 = vpop.f32.mrf.mxu0  ;;  %3142 = vmatmul.msk.f32.vlgmr.msra.gmra.mxu0 %vm870_vm11, %v404_v47 }
 0x235   :  { %3149 = vmatpush.xpose.msk.msrb.mxu0 %vm870_vm11, %v647_v54 }
 0x239   :  { %1185 = vmatpush.msra.mxu0 %v727_v56  ;;  %v607_v57 = vpop.f32.mrf.mxu2  ;;  %v627_v58 = vpop.f32.mrf.mxu3 }
 0x23a   :  { %3145 = vmatpush.xpose.msk.msra.mxu2 %vm870_vm11, %v607_v57  ;;  %3147 = vmatpush.xpose.msk.msrb.mxu3 %vm870_vm11, %v627_v58 }
 0x23c   :  { %v807_v61 = vpop.f32.mrf.mxu0  ;;  %3150 = vmatmul.msk.f32.vlgmr.msrb.gmra.mxu0 %vm870_vm11, %v487_v34 }
 0x23d   :  { %3146 = vmatmul.msk.f32.vlgmr.msra.gmra.mxu2 %vm870_vm11, %v444_v50  ;;  %3148 = vmatmul.msk.f32.vlgmr.msrb.gmra.mxu3 %vm870_vm11, %v464_v51 }
 0x23e   :  { %1277 = vmatpush.msrb.mxu0 %v807_v61 }
 0x241   :  { %v667_v62 = vpop.f32.mrf.mxu3  ;;  %v687_v63 = vpop.f32.mrf.mxu2 }
 0x242   :  { %3151 = vmatpush.xpose.msk.msra.mxu1 %vm870_vm11, %v667_v62  ;;  %3153 = vmatpush.xpose.msk.msrb.mxu2 %vm870_vm11, %v687_v63 }
 0x245   :  { %3152 = vmatmul.msk.f32.vlgmr.msra.gmra.mxu1 %vm870_vm11, %v507_v53  ;;  %3154 = vmatmul.msk.f32.vlgmr.msrb.gmra.mxu2 %vm870_vm11, %v527_v49 }
 0x246   :  { %1208 = vmatpush.msrb.mxu1 %v747_v59 }
 0x248   :  { %1300 = vmatpush.msra.mxu1 %v827_v0 }
 0x249   :  { %v767_v2 = vpop.f32.mrf.mxu2 }
 0x24a   :  { %v707_v1 = vpop.f32.mrf.mxu3  ;;  %1231 = vmatpush.msra.mxu2 %v767_v2 }
 0x24b   :  { %3155 = vmatpush.xpose.msk.msra.mxu3 %vm870_vm11, %v707_v1 }
 0x24e   :  { %3156 = vmatmul.msk.f32.vlgmr.msra.gmra.mxu3 %vm870_vm11, %v547_v55 }
 0x251   :  { %v847_v4 = vpop.f32.mrf.mxu2 }
 0x252   :  { %v787_v3 = vpop.f32.mrf.mxu3  ;;  %1323 = vmatpush.msrb.mxu2 %v847_v4 }
 0x253   :  { %1254 = vmatpush.msrb.mxu3 %v787_v3 }
 0x25a   :  { %v867_v5 = vpop.f32.mrf.mxu3 }
 0x25b   :  { %1346 = vmatpush.msra.mxu3 %v867_v5 }
 0x2a3   :  { %v920_v19 = vpop.f32.mrf.mxu1 }
 0x2a4   :  { %v921_v20 = vadd.f32 %v920_v19, %v383_v6 }
 0x2a6   :  { %v1082_v23 = vsel %vm870_vm11, %v921_v20, -inf }
 0x2b1   :  { %v894_v7 = vpop.f32.mrf.mxu0 }
 0x2b2   :  { %v895_v8 = vadd.f32 %v894_v7, %v383_v6 }
 0x2b4   :  { %v1079_v9 = vsel %vm870_vm11, %v895_v8, -inf }
 0x2b5   :  { %1080 = vmax.xlane.f32.xlu1 %v1079_v9 }
 0x2b9   :  { %v998_v26 = vpop.f32.mrf.mxu0 }
 0x2ba   :  { %v999_v29 = vadd.f32 %v998_v26, %v383_v6 }
 0x2bc   :  { %v1091_v31 = vsel %vm870_vm11, %v999_v29, -inf }
 0x2c0   :  { %v946_v10 = vpop.f32.mrf.mxu2  ;;  %v972_v13 = vpop.f32.mrf.mxu3 }
 0x2c1   :  { %v947_v11 = vadd.f32 %v946_v10, %v383_v6  ;;  %v973_v14 = vadd.f32 %v972_v13, %v383_v6 }
 0x2c2   :  { %v1024_v28 = vpop.f32.mrf.mxu1 }
 0x2c3   :  { %v1085_v12 = vsel %vm870_vm11, %v947_v11, -inf  ;;  %v1088_v17 = vsel %vm870_vm11, %v973_v14, -inf  ;;  %v1025_v30 = vadd.f32 %v1024_v28, %v383_v6 }
 0x2c4   :  { %1086 = vmax.xlane.f32.xlu2 %v1085_v12 }
 0x2c5   :  { %v1094_v32 = vsel %vm870_vm11, %v1025_v30, -inf }
 0x2c8   :  { %v1050_v15 = vpop.f32.mrf.mxu2 }
 0x2c9   :  { %v1051_v16 = vadd.f32 %v1050_v15, %v383_v6 }
 0x2cb   :  { %v1097_v18 = vsel %vm870_vm11, %v1051_v16, -inf }
 0x2cc   :  { %1089 = vmax.xlane.f32.xlu2 %v1088_v17  ;;  %1098 = vmax.xlane.f32.xlu0 %v1097_v18 }
 0x2d1   :  { %v1076_v21 = vpop.f32.mrf.mxu3 }
 0x2d2   :  { %v1077_v22 = vadd.f32 %v1076_v21, %v383_v6 }
 0x2d4   :  { %v1100_v25 = vsel %vm870_vm11, %v1077_v22, -inf  ;;  %1083 = vmax.xlane.f32.xlu2 %v1082_v23 }
 0x2d5   :  { %1101 = vmax.xlane.f32.xlu1 %v1100_v25 }
 0x2dc   :  { %1092 = vmax.xlane.f32.xlu2 %v1091_v31 }
 0x2dd   :  { %1095 = vmax.xlane.f32.xlu1 %v1094_v32 }
 0x328   :  { %v1081_v33 = vpop.xlane.xlu1 %1080 }
 0x329   :  { %v1103_v35 = vsub.f32 %v895_v8, %v1081_v33  ;;  %v3243_v8 = vld [vmem:[%s4681_s29] ss:$0 sm:$0xff]  ;;  %s4685_s29 = sld [smem:[#allocation12_spill]] }
 0x32a   :  { %v115_v9 = vadd.f32 %v3243_v8, %v3939_v44  ;;  %v3984_v15 = vadd.f32 %v3243_v8, %v3941_v45 }
 0x32b   :  { %v1111_v36 = vmul.f32 1.442695, %v1103_v35 }
 0x32d   :  { %3263 = vpow2.f32 %v1111_v36 }
 0x333   :  { %v3264_v37 = vpop.eup %3263 }
 0x334   :  { %v1127_v38 = vsel %vm870_vm11, %v3264_v37, 0.0 }
 0x335   :  { %1128 = vadd.xlane.f32.xlu1 %v1127_v38 }
 0x337   :  { %v1087_v39 = vpop.xlane.xlu2 %1086 }
 0x338   :  { %v1105_v40 = vsub.f32 %v947_v11, %v1087_v39 }
 0x33a   :  { %v1115_v41 = vmul.f32 1.442695, %v1105_v40 }
 0x33c   :  { %3265 = vpow2.f32 %v1115_v41 }
 0x33f   :  { %v1090_v42 = vpop.xlane.xlu2 %1089  ;;  %v1099_v43 = vpop.xlane.xlu0 %1098 }
 0x340   :  { %v1106_v47 = vsub.f32 %v973_v14, %v1090_v42  ;;  %v1109_v48 = vsub.f32 %v1051_v16, %v1099_v43  ;;  %v121_v14 = vsel %vm120_vm2, %v115_v9, 0.0  ;;  %v124_v16 = vsel %vm120_vm2, %v3984_v15, 0.0 }
 0x342   :  { %v3266_v49 = vpop.eup %3265  ;;  %v1117_v50 = vmul.f32 1.442695, %v1106_v47  ;;  %v1123_v51 = vmul.f32 1.442695, %v1109_v48 }
 0x343   :  { %v1133_v52 = vsel %vm870_vm11, %v3266_v49, 0.0 }
 0x344   :  { %3267 = vpow2.f32 %v1117_v50  ;;  %1134 = vadd.xlane.f32.xlu2 %v1133_v52  ;;  %v375_v50 = vld [vmem:[%s4650_s12] sm:$0xff]  ;;  %v378_v52 = vld [vmem:[%s4650_s12 + $0x18] sm:$0xff] }
 0x345   :  { %3269 = vpow2.f32 %v1123_v51  ;;  %v377_v51 = vld [vmem:[%s4650_s12 + $0x10] sm:$0xff] }
 0x347   :  { %v1084_v34 = vpop.xlane.xlu2 %1083 }
 0x348   :  { %v1102_v53 = vpop.xlane.xlu1 %1101  ;;  %v1104_v54 = vsub.f32 %v921_v20, %v1084_v34  ;;  %v381_v34 = vld [vmem:[%s4650_s12 + $0x30] sm:$0xff] }
 0x349   :  { %v1110_v55 = vsub.f32 %v1077_v22, %v1102_v53  ;;  %v376_v53 = vld [vmem:[%s4650_s12 + $0x8] sm:$0xff] }
 0x34a   :  { %v3268_v46 = vpop.eup %3267  ;;  %v1113_v56 = vmul.f32 1.442695, %v1104_v54 }
 0x34b   :  { %v1125_v57 = vmul.f32 1.442695, %v1110_v55  ;;  %v3270_v58 = vpop.eup %3269  ;;  %v1136_v59 = vsel %vm870_vm11, %v3268_v46, 0.0  ;;  %v382_v55 = vld [vmem:[%s4650_s12 + $0x38] sm:$0xff] }
 0x34c   :  { %3271 = vpow2.f32 %v1113_v56  ;;  %v1145_v61 = vsel %vm870_vm11, %v3270_v58, 0.0  ;;  %1137 = vadd.xlane.f32.xlu1 %v1136_v59  ;;  %v380_v56 = vld [vmem:[%s4650_s12 + $0x28] sm:$0xff] }
 0x34d   :  { %3273 = vpow2.f32 %v1125_v57  ;;  %1146 = vadd.xlane.f32.xlu2 %v1145_v61 }
 0x34f   :  { %v1093_v62 = vpop.xlane.xlu2 %1092 }
 0x350   :  { %v1096_v63 = vpop.xlane.xlu1 %1095  ;;  %v1107_v0 = vsub.f32 %v999_v29, %v1093_v62 }
 0x351   :  { %v1108_v1 = vsub.f32 %v1025_v30, %v1096_v63 }
 0x352   :  { %v3272_v2 = vpop.eup %3271  ;;  %v1119_v3 = vmul.f32 1.442695, %v1107_v0 }
 0x353   :  { %v1121_v4 = vmul.f32 1.442695, %v1108_v1  ;;  %v3274_v5 = vpop.eup %3273  ;;  %v1130_v6 = vsel %vm870_vm11, %v3272_v2, 0.0 }
 0x354   :  { %3275 = vpow2.f32 %v1119_v3  ;;  %v1148_v7 = vsel %vm870_vm11, %v3274_v5, 0.0 }
 0x355   :  { %3277 = vpow2.f32 %v1121_v4  ;;  %1131 = vadd.xlane.f32.xlu2 %v1130_v6  ;;  %1149 = vadd.xlane.f32.xlu1 %v1148_v7 }
 0x35a   :  { %v3276_v10 = vpop.eup %3275 }
 0x35b   :  { %v3278_v11 = vpop.eup %3277  ;;  %v1139_v12 = vsel %vm870_vm11, %v3276_v10, 0.0 }
 0x35c   :  { %v1142_v13 = vsel %vm870_vm11, %v3278_v11, 0.0 }
 0x35d   :  { %1140 = vadd.xlane.f32.xlu2 %v1139_v12  ;;  %1143 = vadd.xlane.f32.xlu0 %v1142_v13 }
 0x35e   :  { %122 = vadd.xlane.f32.xlu1 %v121_v14 }
 0x365   :  { %125 = vadd.xlane.f32.xlu2 %v124_v16 }
 0x3a8   :  { %v1129_v17 = vpop.xlane.xlu1 %1128 }
 0x3a9   :  { %3279 = vrcp.f32 %v1129_v17 }
 0x3af   :  { %v3280_v44 = vpop.eup %3279 }
 0x3b0   :  { %v1159_v18 = vmul.f32 %v3280_v44, %v3264_v37 }
 0x3b2   :  { %3157 = vmatmul.msk.f32.vlgmr.msra.gmra.mxu0 %vm870_vm11, %v1159_v18 }
 0x3b3   :  { %1369 = vmatpush.msra.mxu0 %v375_v50 }
 0x3b7   :  { %v1135_v19 = vpop.xlane.xlu2 %1134 }
 0x3b8   :  { %3281 = vrcp.f32 %v1135_v19 }
 0x3be   :  { %v3282_v20 = vpop.eup %3281 }
 0x3bf   :  { %v1161_v21 = vmul.f32 %v3282_v20, %v3266_v49  ;;  %v1138_v22 = vpop.xlane.xlu1 %1137 }
 0x3c0   :  { %v1147_v23 = vpop.xlane.xlu2 %1146  ;;  %3283 = vrcp.f32 %v1138_v22 }
 0x3c1   :  { %3285 = vrcp.f32 %v1147_v23  ;;  %3159 = vmatmul.msk.f32.vlgmr.msra.gmra.mxu2 %vm870_vm11, %v1161_v21 }
 0x3c2   :  { %1415 = vmatpush.msra.mxu2 %v377_v51  ;;  %v1591_v51 = vld [vmem:[%s4652_s14] sm:$0xff] }
 0x3c6   :  { %v3284_v45 = vpop.eup %3283 }
 0x3c7   :  { %v3286_v25 = vpop.eup %3285  ;;  %v1162_v26 = vmul.f32 %v3284_v45, %v3268_v46  ;;  %v379_v46 = vld [vmem:[%s4650_s12 + $0x20] sm:$0xff]  ;;  %s3373_s12 = smov 128  }
 0x3c8   :  { %v1165_v28 = vmul.f32 %v3286_v25, %v3270_v58  ;;  %v1132_v29 = vpop.xlane.xlu2 %1131  ;;  %v1150_v30 = vpop.xlane.xlu1 %1149 }
 0x3c9   :  { %3287 = vrcp.f32 %v1132_v29  ;;  %3160 = vmatmul.msk.f32.vlgmr.msrb.gmra.mxu3 %vm870_vm11, %v1162_v26 }
 0x3ca   :  { %3289 = vrcp.f32 %v1150_v30  ;;  %3163 = vmatmul.msk.f32.vlgmr.msrb.gmra.mxu2 %vm870_vm11, %v1165_v28  ;;  %1438 = vmatpush.msrb.mxu3 %v378_v52  ;;  %v1595_v52 = vld [vmem:[%s4652_s14 + $0x20] sm:$0xff] }
 0x3cb   :  { %1507 = vmatpush.msrb.mxu2 %v381_v34  ;;  %v1599_v34 = vld [vmem:[%s4652_s14 + $0x40] sm:$0xff] }
 0x3cf   :  { %v3288_v31 = vpop.eup %3287 }
 0x3d0   :  { %v3290_v32 = vpop.eup %3289  ;;  %v1160_v33 = vmul.f32 %v3288_v31, %v3272_v2  ;;  %v1141_v35 = vpop.xlane.xlu2 %1140 }
 0x3d1   :  { %v1144_v36 = vpop.xlane.xlu0 %1143  ;;  %v1166_v37 = vmul.f32 %v3290_v32, %v3274_v5  ;;  %3291 = vrcp.f32 %v1141_v35  ;;  %v123_v38 = vpop.xlane.xlu1 %122  ;;  %v1598_v35 = vld [vmem:[%s4652_s14 + $0x38] sm:$0xff] }
 0x3d2   :  { %3293 = vrcp.f32 %v1144_v36  ;;  %v134_v39 = vmul.f32 %v3638_v60, %v123_v38  ;;  %3158 = vmatmul.msk.f32.vlgmr.msrb.gmra.mxu1 %vm870_vm11, %v1160_v33  ;;  %v1594_v33 = vld [vmem:[%s4652_s14 + $0x18] sm:$0xff]  ;;  %v1597_v38 = vld [vmem:[%s4652_s14 + $0x30] sm:$0xff] }
 0x3d3   :  { %3164 = vmatmul.msk.f32.vlgmr.msra.gmra.mxu3 %vm870_vm11, %v1166_v37  ;;  %1392 = vmatpush.msrb.mxu1 %v376_v53  ;;  %v1606_v36 = vld [vmem:[%s4652_s14 + $0x78] sm:$0xff]  ;;  %v1593_v37 = vld [vmem:[%s4652_s14 + $0x10] sm:$0xff]  ;;  %v1603_v53 = vld [vmem:[%s4652_s14 + $0x60] sm:$0xff] }
 0x3d4   :  { %v3995_v40 = vsub.f32 %v115_v9, %v134_v39  ;;  %1530 = vmatpush.msra.mxu3 %v382_v55  ;;  %v1601_v39 = vld [vmem:[%s4652_s14 + $0x50] sm:$0xff]  ;;  %v1614_v55 = vld [vmem:[%s4652_s14 + $0xb8] sm:$0xff] }
 0x3d6   :  { %v138_v41 = vmul.f32 %v3995_v40, %v3995_v40 }
 0x3d7   :  { %v3292_v42 = vpop.eup %3291 }
 0x3d8   :  { %v3294_v43 = vpop.eup %3293  ;;  %v1163_v47 = vmul.f32 %v3292_v42, %v3276_v10  ;;  %v140_v48 = vsel %vm120_vm2, %v138_v41, 0.0  ;;  %v1605_v42 = vld [vmem:[%s4652_s14 + $0x70] sm:$0xff] }
 0x3d9   :  { %v1164_v49 = vmul.f32 %v3294_v43, %v3278_v11  ;;  %141 = vadd.xlane.f32.xlu2 %v140_v48  ;;  %v126_v11 = vpop.xlane.xlu2 %125  ;;  %v1592_v43 = vld [vmem:[%s4652_s14 + $0x8] sm:$0xff] }
 0x3da   :  { %3161 = vmatmul.msk.f32.vlgmr.msrb.gmra.mxu0 %vm870_vm11, %v1163_v47  ;;  %v135_v13 = vmul.f32 %v3638_v60, %v126_v11  ;;  %v1596_v47 = vld [vmem:[%s4652_s14 + $0x28] sm:$0xff] }
 0x3db   :  { %3162 = vmatmul.msk.f32.vlgmr.msra.gmra.mxu1 %vm870_vm11, %v1164_v49  ;;  %1461 = vmatpush.msrb.mxu0 %v379_v46  ;;  %v1600_v48 = vld [vmem:[%s4652_s14 + $0x48] sm:$0xff]  ;;  %v1618_v46 = vld [vmem:[%s4652_s14 + $0xd8] sm:$0xff] }
 0x3dc   :  { %1484 = vmatpush.msra.mxu1 %v380_v56  ;;  %v4047_v22 = vsub.f32 %v3984_v15, %v135_v13  ;;  %v1604_v49 = vld [vmem:[%s4652_s14 + $0x68] sm:$0xff]  ;;  %v1622_v56 = vld [vmem:[%s4652_s14 + $0xf8] sm:$0xff] }
 0x3de   :  { %v139_v29 = vmul.f32 %v4047_v22, %v4047_v22 }
 0x3e0   :  { %v143_v31 = vsel %vm120_vm2, %v139_v29, 0.0 }
 0x42f   :  { %v1187_v54 = vpop.f32.mrf.mxu0 }
 0x430   :  { %3165 = vmatmul.msk.f32.vlgmr.msra.gmra.mxu0 %vm870_vm11, %v1187_v54  ;;  %v1610_v54 = vld [vmem:[%s4652_s14 + $0x98] sm:$0xff] }
 0x431   :  { %1718 = vmatpush.msra.mxu0 %v1594_v33 }
 0x433   :  { %1719 = vmatpush.msra.mxu0 %v1593_v37 }
 0x435   :  { %1720 = vmatpush.msra.mxu0 %v1592_v43 }
 0x437   :  { %1721 = vmatpush.msra.mxu0 %v1591_v51  ;;  %v1625_v51 = vld [vmem:[%s4653_s15 + $0x10] sm:$0xff] }
 0x444   :  { %v1233_v57 = vpop.f32.mrf.mxu2 }
 0x445   :  { %3167 = vmatmul.msk.f32.vlgmr.msra.gmra.mxu2 %vm870_vm11, %v1233_v57 }
 0x44c   :  { %v1256_v58 = vpop.f32.mrf.mxu3  ;;  %v142_v41 = vpop.xlane.xlu2 %141 }
 0x44d   :  { %v1325_v59 = vpop.f32.mrf.mxu2  ;;  %3168 = vmatmul.msk.f32.vlgmr.msrb.gmra.mxu3 %vm870_vm11, %v1256_v58  ;;  %v146_v50 = vmul.f32 %v142_v41, %v3638_v60  ;;  %v1609_v58 = vld [vmem:[%s4652_s14 + $0x90] sm:$0xff]  ;;  %v1626_v41 = vld [vmem:[%s4653_s15 + $0x18] sm:$0xff] }
 0x44e   :  { %3171 = vmatmul.msk.f32.vlgmr.msrb.gmra.mxu2 %vm870_vm11, %v1325_v59  ;;  %1778 = vmatpush.msrb.mxu3 %v1606_v36  ;;  %v1613_v59 = vld [vmem:[%s4652_s14 + $0xb0] sm:$0xff] }
 0x44f   :  { %v1210_v61 = vpop.f32.mrf.mxu1  ;;  %v4122_v57 = vadd.f32 1e-05, %v146_v50  ;;  %v1638_v50 = vld [vmem:[%s4653_s15 + $0x78] sm:$0xff] }
 0x450   :  { %3166 = vmatmul.msk.f32.vlgmr.msrb.gmra.mxu1 %vm870_vm11, %v1210_v61  ;;  %1779 = vmatpush.msrb.mxu3 %v1605_v42  ;;  %v1617_v61 = vld [vmem:[%s4652_s14 + $0xd0] sm:$0xff]  ;;  %v1630_v42 = vld [vmem:[%s4653_s15 + $0x38] sm:$0xff] }
 0x451   :  { %1738 = vmatpush.msrb.mxu1 %v1598_v35  ;;  %3295 = vrsqrt.f32 %v4122_v57  ;;  %vm156_vm1 = vweird.f32 %v4122_v57 }
 0x452   :  { %1780 = vmatpush.msrb.mxu3 %v1604_v49  ;;  %v1634_v49 = vld [vmem:[%s4653_s15 + $0x58] sm:$0xff] }
 0x453   :  { %1739 = vmatpush.msrb.mxu1 %v1597_v38 }
 0x454   :  { %1781 = vmatpush.msrb.mxu3 %v1603_v53 }
 0x455   :  { %1740 = vmatpush.msrb.mxu1 %v1596_v47 }
 0x456   :  { %v1348_v62 = vpop.f32.mrf.mxu3 }
 0x457   :  { %3172 = vmatmul.msk.f32.vlgmr.msra.gmra.mxu3 %vm870_vm11, %v1348_v62  ;;  %v1279_v63 = vpop.f32.mrf.mxu0  ;;  %1741 = vmatpush.msrb.mxu1 %v1595_v52  ;;  %v1621_v62 = vld [vmem:[%s4652_s14 + $0xf0] sm:$0xff] }
 0x458   :  { %v1302_v0 = vpop.f32.mrf.mxu1  ;;  %3169 = vmatmul.msk.f32.vlgmr.msrb.gmra.mxu0 %vm870_vm11, %v1279_v63  ;;  %1861 = vmatpush.msra.mxu3 %v1622_v56  ;;  %v1629_v52 = vld [vmem:[%s4653_s15 + $0x30] sm:$0xff]  ;;  %v1628_v56 = vld [vmem:[%s4653_s15 + $0x28] sm:$0xff] }
 0x459   :  { %3170 = vmatmul.msk.f32.vlgmr.msra.gmra.mxu1 %vm870_vm11, %v1302_v0  ;;  %1801 = vmatpush.msrb.mxu0 %v1610_v54  ;;  %v1608_v0 = vld [vmem:[%s4652_s14 + $0x88] sm:$0xff]  ;;  %v1633_v54 = vld [vmem:[%s4653_s15 + $0x50] sm:$0xff] }
 0x45a   :  { %1821 = vmatpush.msra.mxu1 %v1614_v55  ;;  %1862 = vmatpush.msra.mxu3 %v1621_v62  ;;  %v1637_v55 = vld [vmem:[%s4653_s15 + $0x70] sm:$0xff]  ;;  %v1636_v62 = vld [vmem:[%s4653_s15 + $0x68] sm:$0xff] }
 0x45b   :  { %1802 = vmatpush.msrb.mxu0 %v1609_v58 }
 0x45c   :  { %1822 = vmatpush.msra.mxu1 %v1613_v59 }
 0x45d   :  { %1803 = vmatpush.msrb.mxu0 %v1608_v0  ;;  %v1623_v0 = vld [vmem:[%s4653_s15] sm:$0xff] }
 0x4ad   :  { %v1371_v1 = vpop.f32.mrf.mxu0 }
 0x4ae   :  { %v1535_v4 = vsel %vm120_vm2, %v1371_v1, 0.0  ;;  %v1612_v1 = vld [vmem:[%s4652_s14 + $0xa8] sm:$0xff] }
 0x4af   :  { %1823 = vmatpush.msra.mxu1 %v1612_v1  ;;  %v1627_v1 = vld [vmem:[%s4653_s15 + $0x20] sm:$0xff] }
 0x4c8   :  { %v1417_v2 = vpop.f32.mrf.mxu2 }
 0x4c9   :  { %v1538_v7 = vsel %vm120_vm2, %v1417_v2, 0.0  ;;  %v1616_v2 = vld [vmem:[%s4652_s14 + $0xc8] sm:$0xff] }
 0x4cd   :  { %v1394_v3 = vpop.f32.mrf.mxu1 }
 0x4ce   :  { %v1536_v5 = vsel %vm120_vm2, %v1394_v3, 0.0 }
 0x4cf   :  { %v1537_v6 = vadd.f32 %v1536_v5, %v1535_v4  ;;  %v1620_v4 = vld [vmem:[%s4652_s14 + $0xe8] sm:$0xff]  ;;  %v1607_v5 = vld [vmem:[%s4652_s14 + $0x80] sm:$0xff] }
 0x4d0   :  { %v1440_v8 = vpop.f32.mrf.mxu3  ;;  %1863 = vmatpush.msra.mxu3 %v1620_v4  ;;  %1804 = vmatpush.msrb.mxu0 %v1607_v5 }
 0x4d1   :  { %v1539_v9 = vadd.f32 %v1538_v7, %v1537_v6  ;;  %v1540_v10 = vsel %vm120_vm2, %v1440_v8, 0.0  ;;  %v1509_v17 = vpop.f32.mrf.mxu2  ;;  %v1611_v6 = vld [vmem:[%s4652_s14 + $0xa0] sm:$0xff] }
 0x4d2   :  { %v1545_v23 = vsel %vm120_vm2, %v1509_v17, 0.0  ;;  %v1615_v7 = vld [vmem:[%s4652_s14 + $0xc0] sm:$0xff]  ;;  %1824 = vmatpush.msra.mxu1 %v1611_v6 }
 0x4d3   :  { %v1541_v12 = vadd.f32 %v1540_v10, %v1539_v9  ;;  %v1619_v9 = vld [vmem:[%s4652_s14 + $0xe0] sm:$0xff]  ;;  %v4162_v10 = vpop.eup %3295 }
 0x4d4   :  { %1864 = vmatpush.msra.mxu3 %v1619_v9  ;;  %vm157_vm15 = vweird.f32 %v4162_v10  ;;  %v1631_v6 = vld [vmem:[%s4653_s15 + $0x40] sm:$0xff] }
 0x4d5   :  { %v4040_v14 = vadd.f32 %v1541_v12, %v3554_v24  ;;  %v1463_v16 = vpop.f32.mrf.mxu0  ;;  %vm4208_vm3 = vmor %vm156_vm1, %vm157_vm15  ;;  %v3245_v9 = vld [vmem:[%s4685_s29] ss:$0 sm:$0xff]  ;;  %vm2982_vm15 = vcmask 523264  }
 0x4d6   :  { %v1542_v44 = vsel %vm120_vm2, %v1463_v16, 0.0  ;;  %v1486_v18 = vpop.f32.mrf.mxu1 }
 0x4d7   :  { %v1543_v19 = vsel %vm120_vm2, %v1486_v18, 0.0  ;;  %v1552_v20 = vmul.f32 %v4040_v14, %v4040_v14 }
 0x4d8   :  { %v1544_v21 = vadd.f32 %v1543_v19, %v1542_v44  ;;  %v151_v44 = vmul.f32 %v4162_v10, %v4122_v57 }
 0x4d9   :  { %v1554_v45 = vsel %vm120_vm2, %v1552_v20, 0.0 }
 0x4da   :  { %v1532_v24 = vpop.f32.mrf.mxu3  ;;  %v1546_v25 = vadd.f32 %v1545_v23, %v1544_v21  ;;  %1555 = vadd.xlane.f32.xlu0 %v1554_v45  ;;  %v152_v23 = vmul.f32 %v4162_v10, %v151_v44 }
 0x4db   :  { %v1547_v26 = vsel %vm120_vm2, %v1532_v24, 0.0 }
 0x4dc   :  { %v1548_v28 = vadd.f32 %v1547_v26, %v1546_v25  ;;  %v153_v26 = vmul.f32 0.5, %v152_v23 }
 0x4de   :  { %v4055_v30 = vadd.f32 %v1548_v28, %v3559_v27  ;;  %v1602_v27 = vld [vmem:[%s4652_s14 + $0x58] sm:$0xff]  ;;  %v154_v35 = vsub.f32 1.5, %v153_v26  ;;  %v1643_v26 = vld [vmem:[%s4653_s15 + $0xa0] sm:$0xff] }
 0x4df   :  { %1758 = vmatpush.msra.mxu2 %v1602_v27 }
 0x4e0   :  { %v1553_v15 = vmul.f32 %v4055_v30, %v4055_v30  ;;  %v155_v43 = vmul.f32 %v4162_v10, %v154_v35  ;;  %v1670_v35 = vld [vmem:[%s4654_s16 + $0x78] sm:$0xff] }
 0x4e1   :  { %1759 = vmatpush.msra.mxu2 %v1601_v39 }
 0x4e2   :  { %144 = vadd.xlane.f32.xlu0 %v143_v31  ;;  %v1557_v32 = vsel %vm120_vm2, %v1553_v15, 0.0  ;;  %v3246_v31 = vld [vmem:[%s4651_s13] ss:$0 sm:$0xff]  ;;  %v159_v57 = vsel %vm4208_vm3, %v4162_v10, %v155_v43  ;;  %v1650_v10 = vld [vmem:[%s4653_s15 + $0xd8] sm:$0xff]  ;;  %v1664_v43 = vld [vmem:[%s4654_s16 + $0x48] sm:$0xff] }
 0x4e3   :  { %1558 = vadd.xlane.f32.xlu1 %v1557_v32  ;;  %1760 = vmatpush.msra.mxu2 %v1600_v48 }
 0x4e5   :  { %1761 = vmatpush.msra.mxu2 %v1599_v34  ;;  %v1678_v34 = vld [vmem:[%s4654_s16 + $0xb8] sm:$0xff] }
 0x4e7   :  { %1841 = vmatpush.msrb.mxu2 %v1618_v46  ;;  %v1624_v46 = vld [vmem:[%s4653_s15 + $0x8] sm:$0xff] }
 0x4e9   :  { %1842 = vmatpush.msrb.mxu2 %v1617_v61  ;;  %v1632_v61 = vld [vmem:[%s4653_s15 + $0x48] sm:$0xff] }
 0x4eb   :  { %1843 = vmatpush.msrb.mxu2 %v1616_v2  ;;  %v3244_v2 = vld [vmem:[%s4684_s28] ss:$0 sm:$0xff] }
 0x4ed   :  { %1844 = vmatpush.msrb.mxu2 %v1615_v7  ;;  %v1635_v7 = vld [vmem:[%s4653_s15 + $0x60] sm:$0xff] }
 0x54d   :  { %v1556_v63 = vpop.xlane.xlu0 %1555 }
 0x54e   :  { %v1560_v3 = vmul.f32 %v1556_v63, %v3638_v60 }
 0x550   :  { %v1562_v8 = vadd.f32 1e-06, %v1560_v3  ;;  %v170_v3 = vmul.f32 %v159_v57, %v3995_v40  ;;  %v1642_v40 = vld [vmem:[%s4653_s15 + $0x98] sm:$0xff]  ;;  %v1685_v57 = vld [vmem:[%s4654_s16 + $0xf0] sm:$0xff] }
 0x552   :  { %3297 = vrsqrt.f32 %v1562_v8  ;;  %vm1570_vm13 = vweird.f32 %v1562_v8 }
 0x555   :  { %v145_v11 = vpop.xlane.xlu0 %144 }
 0x556   :  { %v147_v12 = vmul.f32 %v145_v11, %v3638_v60  ;;  %v1559_v13 = vpop.xlane.xlu1 %1558  ;;  %v1654_v11 = vld [vmem:[%s4653_s15 + $0xf8] sm:$0xff] }
 0x557   :  { %v1561_v16 = vmul.f32 %v1559_v13, %v3638_v60 }
 0x558   :  { %v3298_v17 = vpop.eup %3297  ;;  %v4168_v18 = vadd.f32 1e-05, %v147_v12  ;;  %v176_v12 = vmul.f32 %v3244_v2, %v170_v3 }
 0x559   :  { %v1565_v19 = vmul.f32 %v3298_v17, %v1562_v8  ;;  %v1563_v20 = vadd.f32 1e-06, %v1561_v16  ;;  %vm1571_vm12 = vweird.f32 %v3298_v17  ;;  %v1646_v8 = vld [vmem:[%s4653_s15 + $0xb8] sm:$0xff]  ;;  %v1641_v16 = vld [vmem:[%s4653_s15 + $0x90] sm:$0xff] }
 0x55a   :  { %3299 = vrsqrt.f32 %v4168_v18  ;;  %vm1572_vm14 = vmor %vm1570_vm13, %vm1571_vm12  ;;  %vm166_vm7 = vweird.f32 %v4168_v18  ;;  %v4300_v23 = vadd.f32 %v3245_v9, %v176_v12 }
 0x55b   :  { %v1566_v21 = vmul.f32 %v3298_v17, %v1565_v19  ;;  %3301 = vrsqrt.f32 %v1563_v20  ;;  %vm1580_vm4 = vweird.f32 %v1563_v20  ;;  %v1653_v19 = vld [vmem:[%s4653_s15 + $0xf0] sm:$0xff] }
 0x55d   :  { %v1567_v45 = vmul.f32 0.5, %v1566_v21  ;;  %v1644_v21 = vld [vmem:[%s4653_s15 + $0xa8] sm:$0xff] }
 0x55f   :  { %v1568_v24 = vsub.f32 1.5, %v1567_v45 }
 0x560   :  { %v4172_v25 = vpop.eup %3299 }
 0x561   :  { %v3302_v28 = vpop.eup %3301  ;;  %v1569_v29 = vmul.f32 %v3298_v17, %v1568_v24  ;;  %v161_v15 = vmul.f32 %v4172_v25, %v4168_v18  ;;  %vm167_vm6 = vweird.f32 %v4172_v25  ;;  %v1649_v18 = vld [vmem:[%s4653_s15 + $0xd0] sm:$0xff]  ;;  %v1648_v24 = vld [vmem:[%s4653_s15 + $0xc8] sm:$0xff] }
 0x562   :  { %v1575_v32 = vmul.f32 %v3302_v28, %v1563_v20  ;;  %vm1581_vm0 = vweird.f32 %v3302_v28  ;;  %vm4275_vm8 = vmor %vm166_vm7, %vm167_vm6  ;;  %v1640_v20 = vld [vmem:[%s4653_s15 + $0x88] sm:$0xff] }
 0x563   :  { %v1573_v33 = vsel %vm1572_vm14, %v3298_v17, %v1569_v29  ;;  %v162_v36 = vmul.f32 %v4172_v25, %v161_v15  ;;  %vm1582_vm5 = vmor %vm1580_vm4, %vm1581_vm0  ;;  %v1645_v17 = vld [vmem:[%s4653_s15 + $0xb0] sm:$0xff]  ;;  %v1651_v29 = vld [vmem:[%s4653_s15 + $0xe0] sm:$0xff] }
 0x564   :  { %v1584_v27 = vmul.f32 %v1573_v33, %v4040_v14  ;;  %v1576_v37 = vmul.f32 %v3302_v28, %v1575_v32  ;;  %v1662_v32 = vld [vmem:[%s4654_s16 + $0x38] sm:$0xff] }
 0x565   :  { %v163_v47 = vmul.f32 0.5, %v162_v36  ;;  %v1666_v33 = vld [vmem:[%s4654_s16 + $0x58] sm:$0xff]  ;;  %v1661_v36 = vld [vmem:[%s4654_s16 + $0x30] sm:$0xff] }
 0x566   :  { %v1589_v38 = vmul.f32 %v3246_v31, %v1584_v27  ;;  %v1577_v39 = vmul.f32 0.5, %v1576_v37  ;;  %v1657_v27 = vld [vmem:[%s4654_s16 + $0x10] sm:$0xff] }
 0x567   :  { %v164_v58 = vsub.f32 1.5, %v163_v47  ;;  %v1668_v47 = vld [vmem:[%s4654_s16 + $0x68] sm:$0xff] }
 0x568   :  { %v1578_v48 = vsub.f32 1.5, %v1577_v39  ;;  %3173 = vmatmul.msk.f32.vlgmr.msra.gmra.mxu0 %vm120_vm2, %v1589_v38  ;;  %3174 = vmatmul.msk.f32.vlgmr.msrb.gmra.mxu1 %vm120_vm2, %v1589_v38  ;;  %v1669_v39 = vld [vmem:[%s4654_s16 + $0x70] sm:$0xff] }
 0x569   :  { %3175 = vmatmul.msk.f32.vlgmr.msra.gmra.mxu2 %vm120_vm2, %v1589_v38  ;;  %3176 = vmatmul.msk.f32.vlgmr.msrb.gmra.mxu3 %vm120_vm2, %v1589_v38  ;;  %v165_v5 = vmul.f32 %v4172_v25, %v164_v58  ;;  %v1665_v38 = vld [vmem:[%s4654_s16 + $0x50] sm:$0xff]  ;;  %v1672_v58 = vld [vmem:[%s4654_s16 + $0x88] sm:$0xff] }
 0x56a   :  { %v1579_v53 = vmul.f32 %v3302_v28, %v1578_v48  ;;  %1884 = vmatpush.msra.mxu0 %v1626_v41  ;;  %1904 = vmatpush.msrb.mxu1 %v1630_v42  ;;  %v1656_v41 = vld [vmem:[%s4654_s16 + $0x8] sm:$0xff]  ;;  %v1655_v48 = vld [vmem:[%s4654_s16] sm:$0xff] }
 0x56b   :  { %1924 = vmatpush.msra.mxu2 %v1634_v49  ;;  %1944 = vmatpush.msrb.mxu3 %v1638_v50  ;;  %v169_v44 = vsel %vm4275_vm8, %v4172_v25, %v165_v5  ;;  %v1652_v25 = vld [vmem:[%s4653_s15 + $0xe8] sm:$0xff]  ;;  %v1659_v49 = vld [vmem:[%s4654_s16 + $0x20] sm:$0xff] }
 0x56c   :  { %v1583_v59 = vsel %vm1582_vm5, %v3302_v28, %v1579_v53  ;;  %1885 = vmatpush.msra.mxu0 %v1625_v51  ;;  %1905 = vmatpush.msrb.mxu1 %v1629_v52  ;;  %v171_v45 = vmul.f32 %v169_v44, %v4047_v22  ;;  %v1639_v22 = vld [vmem:[%s4653_s15 + $0x80] sm:$0xff]  ;;  %v1660_v42 = vld [vmem:[%s4654_s16 + $0x28] sm:$0xff]  ;;  %v1674_v52 = vld [vmem:[%s4654_s16 + $0x98] sm:$0xff] }
 0x56d   :  { %v1585_v63 = vmul.f32 %v1583_v59, %v4055_v30  ;;  %1925 = vmatpush.msra.mxu2 %v1633_v54  ;;  %1945 = vmatpush.msrb.mxu3 %v1637_v55  ;;  %v1647_v28 = vld [vmem:[%s4653_s15 + $0xc0] sm:$0xff]  ;;  %v1682_v53 = vld [vmem:[%s4654_s16 + $0xd8] sm:$0xff]  ;;  %v1673_v55 = vld [vmem:[%s4654_s16 + $0x90] sm:$0xff] }
 0x56e   :  { %1886 = vmatpush.msra.mxu0 %v1624_v46  ;;  %1906 = vmatpush.msrb.mxu1 %v1628_v56  ;;  %v177_v15 = vmul.f32 %v3244_v2, %v171_v45  ;;  %v1663_v50 = vld [vmem:[%s4654_s16 + $0x40] sm:$0xff]  ;;  %v1686_v54 = vld [vmem:[%s4654_s16 + $0xf8] sm:$0xff]  ;;  %v1677_v46 = vld [vmem:[%s4654_s16 + $0xb0] sm:$0xff] }
 0x56f   :  { %v1590_v4 = vmul.f32 %v3246_v31, %v1585_v63  ;;  %1926 = vmatpush.msra.mxu2 %v1632_v61  ;;  %1946 = vmatpush.msrb.mxu3 %v1636_v62  ;;  %v1658_v31 = vld [vmem:[%s4654_s16 + $0x18] sm:$0xff]  ;;  %v1667_v51 = vld [vmem:[%s4654_s16 + $0x60] sm:$0xff]  ;;  %v1681_v56 = vld [vmem:[%s4654_s16 + $0xd0] sm:$0xff] }
 0x570   :  { %1887 = vmatpush.msra.mxu0 %v1623_v0  ;;  %1907 = vmatpush.msrb.mxu1 %v1627_v1  ;;  %v4347_v37 = vadd.f32 %v3245_v9, %v177_v15  ;;  %v1676_v59 = vld [vmem:[%s4654_s16 + $0xa8] sm:$0xff]  ;;  %v1671_v63 = vld [vmem:[%s4654_s16 + $0x80] sm:$0xff] }
 0x571   :  { %3177 = vmatmul.msk.f32.vlgmr.msrb.gmra.mxu0 %vm120_vm2, %v1590_v4  ;;  %3178 = vmatmul.msk.f32.vlgmr.msra.gmra.mxu1 %vm120_vm2, %v1590_v4  ;;  %v1680_v61 = vld [vmem:[%s4654_s16 + $0xc8] sm:$0xff]  ;;  %v1675_v0 = vld [vmem:[%s4654_s16 + $0xa0] sm:$0xff] }
 0x572   :  { %3179 = vmatmul.msk.f32.vlgmr.msrb.gmra.mxu2 %vm120_vm2, %v1590_v4  ;;  %3180 = vmatmul.msk.f32.vlgmr.msra.gmra.mxu3 %vm120_vm2, %v1590_v4  ;;  %v1684_v62 = vld [vmem:[%s4654_s16 + $0xe8] sm:$0xff]  ;;  %v1679_v1 = vld [vmem:[%s4654_s16 + $0xc0] sm:$0xff] }
 0x573   :  { %1927 = vmatpush.msra.mxu2 %v1631_v6  ;;  %1947 = vmatpush.msrb.mxu3 %v1635_v7  ;;  %v1683_v2 = vld [vmem:[%s4654_s16 + $0xe0] sm:$0xff] }
 0x574   :  { %1967 = vmatpush.msrb.mxu0 %v1642_v40  ;;  %1987 = vmatpush.msra.mxu1 %v1646_v8 }
 0x575   :  { %2007 = vmatpush.msrb.mxu2 %v1650_v10  ;;  %2027 = vmatpush.msra.mxu3 %v1654_v11 }
 0x576   :  { %1968 = vmatpush.msrb.mxu0 %v1641_v16  ;;  %1988 = vmatpush.msra.mxu1 %v1645_v17 }
 0x577   :  { %2008 = vmatpush.msrb.mxu2 %v1649_v18  ;;  %2028 = vmatpush.msra.mxu3 %v1653_v19 }
 0x578   :  { %1969 = vmatpush.msrb.mxu0 %v1640_v20  ;;  %1989 = vmatpush.msra.mxu1 %v1644_v21 }
 0x579   :  { %3181 = vmatmul.msk.f32.vlgmr.msra.gmra.mxu0 %vm120_vm2, %v4300_v23  ;;  %3182 = vmatmul.msk.f32.vlgmr.msrb.gmra.mxu1 %vm120_vm2, %v4300_v23 }
 0x57a   :  { %3183 = vmatmul.msk.f32.vlgmr.msra.gmra.mxu2 %vm120_vm2, %v4300_v23  ;;  %3184 = vmatmul.msk.f32.vlgmr.msrb.gmra.mxu3 %vm120_vm2, %v4300_v23 }
 0x57b   :  { %2009 = vmatpush.msrb.mxu2 %v1648_v24  ;;  %2029 = vmatpush.msra.mxu3 %v1652_v25 }
 0x57c   :  { %1970 = vmatpush.msrb.mxu0 %v1639_v22  ;;  %1990 = vmatpush.msra.mxu1 %v1643_v26  ;;  %v3251_v26 = vld [vmem:[%s4688_s25 + $0x2] ss:$0 sm:$0xff] }
 0x57d   :  { %2010 = vmatpush.msrb.mxu2 %v1647_v28  ;;  %2030 = vmatpush.msra.mxu3 %v1651_v29  ;;  %v3252_v28 = vld [vmem:[%s4688_s25 + $0x3] ss:$0 sm:$0xff] }
 0x57e   :  { %2047 = vmatpush.msra.mxu0 %v1658_v31  ;;  %2067 = vmatpush.msrb.mxu1 %v1662_v32 }
 0x57f   :  { %2087 = vmatpush.msra.mxu2 %v1666_v33  ;;  %2107 = vmatpush.msrb.mxu3 %v1670_v35 }
 0x580   :  { %2048 = vmatpush.msra.mxu0 %v1657_v27  ;;  %2068 = vmatpush.msrb.mxu1 %v1661_v36  ;;  %v3248_v27 = vld [vmem:[%s4688_s25 + $0x1] ss:$0 sm:$0xff] }
 0x581   :  { %3185 = vmatmul.msk.f32.vlgmr.msrb.gmra.mxu0 %vm120_vm2, %v4347_v37  ;;  %3186 = vmatmul.msk.f32.vlgmr.msra.gmra.mxu1 %vm120_vm2, %v4347_v37 }
 0x582   :  { %3187 = vmatmul.msk.f32.vlgmr.msrb.gmra.mxu2 %vm120_vm2, %v4347_v37  ;;  %3188 = vmatmul.msk.f32.vlgmr.msra.gmra.mxu3 %vm120_vm2, %v4347_v37 }
 0x583   :  { %2088 = vmatpush.msra.mxu2 %v1665_v38  ;;  %2108 = vmatpush.msrb.mxu3 %v1669_v39  ;;  %v3247_v38 = vld [vmem:[%s4688_s25] ss:$0 sm:$0xff]  ;;  %v3253_v39 = vld [vmem:[%s4688_s25 + $0x6] ss:$0 sm:$0xff] }
 0x584   :  { %2049 = vmatpush.msra.mxu0 %v1656_v41  ;;  %2069 = vmatpush.msrb.mxu1 %v1660_v42 }
 0x585   :  { %2089 = vmatpush.msra.mxu2 %v1664_v43  ;;  %2109 = vmatpush.msrb.mxu3 %v1668_v47 }
 0x586   :  { %2050 = vmatpush.msra.mxu0 %v1655_v48  ;;  %2070 = vmatpush.msrb.mxu1 %v1659_v49  ;;  %v3250_v48 = vld [vmem:[%s4688_s25 + $0x5] ss:$0 sm:$0xff]  ;;  %v3254_v49 = vld [vmem:[%s4688_s25 + $0x7] ss:$0 sm:$0xff] }
 0x587   :  { %2090 = vmatpush.msra.mxu2 %v1663_v50  ;;  %2110 = vmatpush.msrb.mxu3 %v1667_v51 }
 0x588   :  { %2127 = vmatpush.msrb.mxu0 %v1674_v52  ;;  %2147 = vmatpush.msra.mxu1 %v1678_v34  ;;  %v3249_v52 = vld [vmem:[%s4688_s25 + $0x4] ss:$0 sm:$0xff] }
 0x589   :  { %3189 = vmatmul.msk.f32.vlgmr.msra.gmra.mxu0 %vm120_vm2, %v4300_v23  ;;  %3190 = vmatmul.msk.f32.vlgmr.msrb.gmra.mxu1 %vm120_vm2, %v4300_v23 }
 0x58a   :  { %3191 = vmatmul.msk.f32.vlgmr.msra.gmra.mxu2 %vm120_vm2, %v4300_v23  ;;  %3192 = vmatmul.msk.f32.vlgmr.msrb.gmra.mxu3 %vm120_vm2, %v4300_v23 }
 0x58b   :  { %2167 = vmatpush.msrb.mxu2 %v1682_v53  ;;  %2187 = vmatpush.msra.mxu3 %v1686_v54 }
 0x58c   :  { %2128 = vmatpush.msrb.mxu0 %v1673_v55  ;;  %2148 = vmatpush.msra.mxu1 %v1677_v46 }
 0x58d   :  { %2168 = vmatpush.msrb.mxu2 %v1681_v56  ;;  %2188 = vmatpush.msra.mxu3 %v1685_v57 }
 0x58e   :  { %2129 = vmatpush.msrb.mxu0 %v1672_v58  ;;  %2149 = vmatpush.msra.mxu1 %v1676_v59 }
 0x58f   :  { %2169 = vmatpush.msrb.mxu2 %v1680_v61  ;;  %2189 = vmatpush.msra.mxu3 %v1684_v62 }
 0x590   :  { %2130 = vmatpush.msrb.mxu0 %v1671_v63  ;;  %2150 = vmatpush.msra.mxu1 %v1675_v0 }
 0x591   :  { %2170 = vmatpush.msrb.mxu2 %v1679_v1  ;;  %2190 = vmatpush.msra.mxu3 %v1683_v2 }
 0x592   :  { %3193 = vmatmul.msk.f32.vlgmr.msrb.gmra.mxu0 %vm120_vm2, %v4347_v37  ;;  %3194 = vmatmul.msk.f32.vlgmr.msra.gmra.mxu1 %vm120_vm2, %v4347_v37 }
 0x593   :  { %3195 = vmatmul.msk.f32.vlgmr.msrb.gmra.mxu2 %vm120_vm2, %v4347_v37  ;;  %3196 = vmatmul.msk.f32.vlgmr.msra.gmra.mxu3 %vm120_vm2, %v4347_v37 }
 0x5e5   :  { %v1723_v3 = vpop.f32.mrf.mxu0  ;;  %v1743_v4 = vpop.f32.mrf.mxu1 }
 0x5ec   :  { %v1763_v5 = vpop.f32.mrf.mxu2  ;;  %v1783_v6 = vpop.f32.mrf.mxu3 }
 0x5ee   :  { %v1806_v7 = vpop.f32.mrf.mxu0  ;;  %v1826_v40 = vpop.f32.mrf.mxu1 }
 0x5f5   :  { %v1846_v8 = vpop.f32.mrf.mxu2  ;;  %v1866_v9 = vpop.f32.mrf.mxu3 }
 0x5f6   :  { %v1889_v10 = vpop.f32.mrf.mxu0  ;;  %v1909_v11 = vpop.f32.mrf.mxu1 }
 0x5f7   :  { %3197 = vmatpush.xpose.msk.msra.mxu0 %vm870_vm11, %v1889_v10  ;;  %3199 = vmatpush.xpose.msk.msrb.mxu1 %vm870_vm11, %v1909_v11 }
 0x5fa   :  { %3198 = vmatmul.msk.f32.vlgmr.msra.gmra.mxu0 %vm870_vm11, %v1723_v3  ;;  %3200 = vmatmul.msk.f32.vlgmr.msrb.gmra.mxu1 %vm870_vm11, %v1743_v4 }
 0x5fd   :  { %v1929_v12 = vpop.f32.mrf.mxu2  ;;  %v1949_v13 = vpop.f32.mrf.mxu3 }
 0x5fe   :  { %3201 = vmatpush.xpose.msk.msra.mxu2 %vm870_vm11, %v1929_v12  ;;  %3203 = vmatpush.xpose.msk.msrb.mxu3 %vm870_vm11, %v1949_v13  ;;  %v1972_v16 = vpop.f32.mrf.mxu0  ;;  %v1992_v17 = vpop.f32.mrf.mxu1 }
 0x5ff   :  { %3205 = vmatpush.xpose.msk.msrb.mxu0 %vm870_vm11, %v1972_v16  ;;  %3207 = vmatpush.xpose.msk.msra.mxu1 %vm870_vm11, %v1992_v17 }
 0x601   :  { %3202 = vmatmul.msk.f32.vlgmr.msra.gmra.mxu2 %vm870_vm11, %v1763_v5  ;;  %3204 = vmatmul.msk.f32.vlgmr.msrb.gmra.mxu3 %vm870_vm11, %v1783_v6 }
 0x602   :  { %3206 = vmatmul.msk.f32.vlgmr.msrb.gmra.mxu0 %vm870_vm11, %v1806_v7  ;;  %3208 = vmatmul.msk.f32.vlgmr.msra.gmra.mxu1 %vm870_vm11, %v1826_v40 }
 0x605   :  { %v2012_v44 = vpop.f32.mrf.mxu2  ;;  %v2032_v18 = vpop.f32.mrf.mxu3 }
 0x606   :  { %3209 = vmatpush.xpose.msk.msrb.mxu2 %vm870_vm11, %v2012_v44  ;;  %3211 = vmatpush.xpose.msk.msra.mxu3 %vm870_vm11, %v2032_v18  ;;  %v2052_v19 = vpop.f32.mrf.mxu0  ;;  %v2072_v20 = vpop.f32.mrf.mxu1 }
 0x607   :  { %2533 = vmatpush.msra.mxu0 %v2052_v19  ;;  %2556 = vmatpush.msrb.mxu1 %v2072_v20 }
 0x609   :  { %3210 = vmatmul.msk.f32.vlgmr.msrb.gmra.mxu2 %vm870_vm11, %v1846_v8  ;;  %3212 = vmatmul.msk.f32.vlgmr.msra.gmra.mxu3 %vm870_vm11, %v1866_v9 }
 0x60d   :  { %v2092_v21 = vpop.f32.mrf.mxu2  ;;  %v2112_v23 = vpop.f32.mrf.mxu3 }
 0x60e   :  { %2579 = vmatpush.msra.mxu2 %v2092_v21  ;;  %2602 = vmatpush.msrb.mxu3 %v2112_v23 }
 0x60f   :  { %v2132_v45 = vpop.f32.mrf.mxu0  ;;  %v2152_v24 = vpop.f32.mrf.mxu1 }
 0x610   :  { %2625 = vmatpush.msrb.mxu0 %v2132_v45  ;;  %2648 = vmatpush.msra.mxu1 %v2152_v24 }
 0x616   :  { %v2172_v25 = vpop.f32.mrf.mxu2  ;;  %v2192_v22 = vpop.f32.mrf.mxu3 }
 0x617   :  { %2671 = vmatpush.msrb.mxu2 %v2172_v25  ;;  %2694 = vmatpush.msra.mxu3 %v2192_v22 }
 0x677   :  { %v2268_v33 = vpop.f32.mrf.mxu1  ;;  %v2242_v35 = vpop.f32.mrf.mxu0 }
 0x678   :  { %v2269_v41 = vadd.f32 %v3248_v27, %v2268_v33  ;;  %v2243_v42 = vadd.f32 %v3247_v38, %v2242_v35 }
 0x67a   :  { %v2430_v51 = vsel %vm870_vm11, %v2269_v41, -inf  ;;  %v2427_v54 = vsel %vm870_vm11, %v2243_v42, -inf }
 0x67f   :  { %v2372_v34 = vpop.f32.mrf.mxu1  ;;  %v2346_v55 = vpop.f32.mrf.mxu0 }
 0x680   :  { %v2373_v46 = vadd.f32 %v3250_v48, %v2372_v34  ;;  %v2347_v57 = vadd.f32 %v3249_v52, %v2346_v55 }
 0x682   :  { %v2442_v59 = vsel %vm870_vm11, %v2373_v46, -inf  ;;  %v2439_v61 = vsel %vm870_vm11, %v2347_v57, -inf }
 0x684   :  { %v2294_v29 = vpop.f32.mrf.mxu2  ;;  %v2320_v15 = vpop.f32.mrf.mxu3 }
 0x685   :  { %v2295_v31 = vadd.f32 %v3251_v26, %v2294_v29  ;;  %v2321_v32 = vadd.f32 %v3252_v28, %v2320_v15 }
 0x687   :  { %v2436_v36 = vsel %vm870_vm11, %v2321_v32, -inf  ;;  %v2433_v37 = vsel %vm870_vm11, %v2295_v31, -inf }
 0x688   :  { %2437 = vmax.xlane.f32.xlu2 %v2436_v36  ;;  %2434 = vmax.xlane.f32.xlu1 %v2433_v37 }
 0x68c   :  { %v2398_v43 = vpop.f32.mrf.mxu2  ;;  %v2424_v53 = vpop.f32.mrf.mxu3 }
 0x68d   :  { %v2399_v47 = vadd.f32 %v3253_v39, %v2398_v43  ;;  %v2425_v56 = vadd.f32 %v3254_v49, %v2424_v53 }
 0x68f   :  { %v2445_v50 = vsel %vm870_vm11, %v2399_v47, -inf  ;;  %v2448_v58 = vsel %vm870_vm11, %v2425_v56, -inf }
 0x690   :  { %2446 = vmax.xlane.f32.xlu0 %v2445_v50  ;;  %2431 = vmax.xlane.f32.xlu2 %v2430_v51 }
 0x691   :  { %2428 = vmax.xlane.f32.xlu1 %v2427_v54 }
 0x698   :  { %2449 = vmax.xlane.f32.xlu0 %v2448_v58  ;;  %2443 = vmax.xlane.f32.xlu2 %v2442_v59 }
 0x699   :  { %2440 = vmax.xlane.f32.xlu1 %v2439_v61 }
 0x6fb   :  { %v2438_v62 = vpop.xlane.xlu2 %2437  ;;  %v2435_v63 = vpop.xlane.xlu1 %2434 }
 0x6fc   :  { %v2454_v0 = vsub.f32 %v2321_v32, %v2438_v62  ;;  %v2453_v1 = vsub.f32 %v2295_v31, %v2435_v63 }
 0x6fe   :  { %v2465_v2 = vmul.f32 1.442695, %v2454_v0  ;;  %v2463_v3 = vmul.f32 1.442695, %v2453_v1  ;;  %v1689_v1 = vld [vmem:[%s4655_s17 + $0x10] sm:$0xff] }
 0x700   :  { %3303 = vpow2.f32 %v2465_v2  ;;  %v1690_v2 = vld [vmem:[%s4655_s17 + $0x18] sm:$0xff] }
 0x701   :  { %3305 = vpow2.f32 %v2463_v3  ;;  %v1687_v3 = vld [vmem:[%s4655_s17] sm:$0xff] }
 0x703   :  { %v2447_v4 = vpop.xlane.xlu0 %2446  ;;  %v2432_v5 = vpop.xlane.xlu2 %2431 }
 0x704   :  { %v2457_v6 = vsub.f32 %v2399_v47, %v2447_v4  ;;  %v2452_v7 = vsub.f32 %v2269_v41, %v2432_v5  ;;  %v2429_v40 = vpop.xlane.xlu1 %2428  ;;  %v1688_v4 = vld [vmem:[%s4655_s17 + $0x8] sm:$0xff]  ;;  %v1693_v5 = vld [vmem:[%s4655_s17 + $0x30] sm:$0xff] }
 0x705   :  { %v2451_v8 = vsub.f32 %v2243_v42, %v2429_v40  ;;  %v1694_v40 = vld [vmem:[%s4655_s17 + $0x38] sm:$0xff] }
 0x706   :  { %v3304_v9 = vpop.eup %3303  ;;  %v2471_v10 = vmul.f32 1.442695, %v2457_v6  ;;  %v2461_v11 = vmul.f32 1.442695, %v2452_v7  ;;  %v1691_v6 = vld [vmem:[%s4655_s17 + $0x20] sm:$0xff]  ;;  %v1692_v7 = vld [vmem:[%s4655_s17 + $0x28] sm:$0xff] }
 0x707   :  { %v3306_v12 = vpop.eup %3305  ;;  %v2459_v13 = vmul.f32 1.442695, %v2451_v8  ;;  %v2484_v16 = vsel %vm870_vm11, %v3304_v9, 0.0 }
 0x708   :  { %3307 = vpow2.f32 %v2471_v10  ;;  %v2481_v17 = vsel %vm870_vm11, %v3306_v12, 0.0  ;;  %2485 = vadd.xlane.f32.xlu1 %v2484_v16 }
 0x709   :  { %3309 = vpow2.f32 %v2461_v11  ;;  %2482 = vadd.xlane.f32.xlu0 %v2481_v17 }
 0x70a   :  { %3311 = vpow2.f32 %v2459_v13 }
 0x70b   :  { %v2450_v44 = vpop.xlane.xlu0 %2449  ;;  %v2444_v18 = vpop.xlane.xlu2 %2443 }
 0x70c   :  { %v2458_v19 = vsub.f32 %v2425_v56, %v2450_v44  ;;  %v2456_v20 = vsub.f32 %v2373_v46, %v2444_v18  ;;  %v2441_v21 = vpop.xlane.xlu1 %2440 }
 0x70d   :  { %v2455_v23 = vsub.f32 %v2347_v57, %v2441_v21 }
 0x70e   :  { %v3308_v45 = vpop.eup %3307  ;;  %v2473_v24 = vmul.f32 1.442695, %v2458_v19  ;;  %v2469_v25 = vmul.f32 1.442695, %v2456_v20 }
 0x70f   :  { %v3310_v22 = vpop.eup %3309  ;;  %v2467_v26 = vmul.f32 1.442695, %v2455_v23  ;;  %v2493_v28 = vsel %vm870_vm11, %v3308_v45, 0.0 }
 0x710   :  { %v3312_v29 = vpop.eup %3311  ;;  %3313 = vpow2.f32 %v2473_v24  ;;  %2494 = vadd.xlane.f32.xlu2 %v2493_v28  ;;  %v2478_v15 = vsel %vm870_vm11, %v3310_v22, 0.0 }
 0x711   :  { %3315 = vpow2.f32 %v2469_v25  ;;  %2479 = vadd.xlane.f32.xlu1 %v2478_v15  ;;  %v2475_v31 = vsel %vm870_vm11, %v3312_v29, 0.0 }
 0x712   :  { %3317 = vpow2.f32 %v2467_v26  ;;  %2476 = vadd.xlane.f32.xlu0 %v2475_v31 }
 0x716   :  { %v3314_v32 = vpop.eup %3313 }
 0x717   :  { %v3316_v33 = vpop.eup %3315  ;;  %v2496_v35 = vsel %vm870_vm11, %v3314_v32, 0.0 }
 0x718   :  { %v3318_v27 = vpop.eup %3317  ;;  %2497 = vadd.xlane.f32.xlu2 %v2496_v35  ;;  %v2490_v36 = vsel %vm870_vm11, %v3316_v33, 0.0 }
 0x719   :  { %2491 = vadd.xlane.f32.xlu1 %v2490_v36  ;;  %v2487_v37 = vsel %vm870_vm11, %v3318_v27, 0.0 }
 0x71a   :  { %2488 = vadd.xlane.f32.xlu0 %v2487_v37 }
 0x77b   :  { %v2486_v38 = vpop.xlane.xlu1 %2485 }
 0x77c   :  { %v2483_v39 = vpop.xlane.xlu0 %2482  ;;  %3319 = vrcp.f32 %v2486_v38 }
 0x77d   :  { %3321 = vrcp.f32 %v2483_v39 }
 0x782   :  { %v3320_v41 = vpop.eup %3319 }
 0x783   :  { %v3322_v42 = vpop.eup %3321  ;;  %v2510_v43 = vmul.f32 %v3320_v41, %v3304_v9  ;;  %v2495_v47 = vpop.xlane.xlu2 %2494 }
 0x784   :  { %v2509_v48 = vmul.f32 %v3322_v42, %v3306_v12  ;;  %3323 = vrcp.f32 %v2495_v47  ;;  %v2480_v49 = vpop.xlane.xlu1 %2479 }
 0x785   :  { %v2477_v50 = vpop.xlane.xlu0 %2476  ;;  %3325 = vrcp.f32 %v2480_v49  ;;  %3216 = vmatmul.msk.f32.vlgmr.msrb.gmra.mxu3 %vm870_vm11, %v2510_v43  ;;  %v2941_v49 = vld [vmem:[%s4657_s19 + $0x10] sm:$0xff] }
 0x786   :  { %3327 = vrcp.f32 %v2477_v50  ;;  %3215 = vmatmul.msk.f32.vlgmr.msra.gmra.mxu2 %vm870_vm11, %v2509_v48  ;;  %2786 = vmatpush.msrb.mxu3 %v1690_v2  ;;  %v2942_v48 = vld [vmem:[%s4657_s19 + $0x18] sm:$0xff]  ;;  %v2939_v50 = vld [vmem:[%s4657_s19] sm:$0xff] }
 0x787   :  { %2763 = vmatpush.msra.mxu2 %v1689_v1  ;;  %v2976_v1 = vld [vmem:[%s4658_s20 + $0x10] sm:$0xff] }
 0x78a   :  { %v3324_v51 = vpop.eup %3323 }
 0x78b   :  { %v3326_v52 = vpop.eup %3325  ;;  %v2513_v34 = vmul.f32 %v3324_v51, %v3308_v45  ;;  %v2498_v53 = vpop.xlane.xlu2 %2497 }
 0x78c   :  { %v3328_v54 = vpop.eup %3327  ;;  %v2508_v55 = vmul.f32 %v3326_v52, %v3310_v22  ;;  %3329 = vrcp.f32 %v2498_v53  ;;  %v2492_v46 = vpop.xlane.xlu1 %2491  ;;  %v2981_v53 = vld [vmem:[%s4658_s20 + $0x38] sm:$0xff] }
 0x78d   :  { %v2507_v56 = vmul.f32 %v3328_v54, %v3312_v29  ;;  %v2489_v57 = vpop.xlane.xlu0 %2488  ;;  %3331 = vrcp.f32 %v2492_v46  ;;  %v2980_v54 = vld [vmem:[%s4658_s20 + $0x30] sm:$0xff] }
 0x78e   :  { %3333 = vrcp.f32 %v2489_v57  ;;  %3214 = vmatmul.msk.f32.vlgmr.msrb.gmra.mxu1 %vm870_vm11, %v2508_v55  ;;  %3219 = vmatmul.msk.f32.vlgmr.msrb.gmra.mxu2 %vm870_vm11, %v2513_v34  ;;  %v2979_v55 = vld [vmem:[%s4658_s20 + $0x28] sm:$0xff]  ;;  %v2978_v57 = vld [vmem:[%s4658_s20 + $0x20] sm:$0xff] }
 0x78f   :  { %3213 = vmatmul.msk.f32.vlgmr.msra.gmra.mxu0 %vm870_vm11, %v2507_v56  ;;  %2740 = vmatpush.msrb.mxu1 %v1688_v4  ;;  %v3255_v4 = vld [vmem:[%s4656_s18] ss:$0 sm:$0xff] }
 0x790   :  { %2717 = vmatpush.msra.mxu0 %v1687_v3  ;;  %2855 = vmatpush.msrb.mxu2 %v1693_v5 }
 0x792   :  { %v3330_v58 = vpop.eup %3329 }
 0x793   :  { %v3332_v59 = vpop.eup %3331  ;;  %v2514_v61 = vmul.f32 %v3330_v58, %v3314_v32 }
 0x794   :  { %v3334_v62 = vpop.eup %3333  ;;  %v2512_v63 = vmul.f32 %v3332_v59, %v3316_v33 }
 0x795   :  { %v2511_v0 = vmul.f32 %v3334_v62, %v3318_v27  ;;  %3220 = vmatmul.msk.f32.vlgmr.msra.gmra.mxu3 %vm870_vm11, %v2514_v61  ;;  %v2977_v62 = vld [vmem:[%s4658_s20 + $0x18] sm:$0xff] }
 0x796   :  { %3218 = vmatmul.msk.f32.vlgmr.msra.gmra.mxu1 %vm870_vm11, %v2512_v63  ;;  %2878 = vmatpush.msra.mxu3 %v1694_v40 }
 0x797   :  { %3217 = vmatmul.msk.f32.vlgmr.msrb.gmra.mxu0 %vm870_vm11, %v2511_v0  ;;  %2832 = vmatpush.msra.mxu1 %v1692_v7 }
 0x798   :  { %2809 = vmatpush.msrb.mxu0 %v1691_v6 }
 0x808   :  { %v2604_v8 = vpop.f32.mrf.mxu3 }
 0x809   :  { %v2581_v9 = vpop.f32.mrf.mxu2  ;;  %3224 = vmatmul.msk.f32.vlgmr.msrb.gmra.mxu3 %vm870_vm11, %v2604_v8 }
 0x80a   :  { %3223 = vmatmul.msk.f32.vlgmr.msra.gmra.mxu2 %vm870_vm11, %v2581_v9 }
 0x80b   :  { %v2558_v10 = vpop.f32.mrf.mxu1 }
 0x80c   :  { %v2535_v11 = vpop.f32.mrf.mxu0  ;;  %3222 = vmatmul.msk.f32.vlgmr.msrb.gmra.mxu1 %vm870_vm11, %v2558_v10 }
 0x80d   :  { %3221 = vmatmul.msk.f32.vlgmr.msra.gmra.mxu0 %vm870_vm11, %v2535_v11  ;;  %2997 = vmatpush.msrb.mxu1 %v2981_v53 }
 0x80e   :  { %2961 = vmatpush.msra.mxu0 %v2942_v48 }
 0x80f   :  { %2998 = vmatpush.msrb.mxu1 %v2980_v54 }
 0x810   :  { %2962 = vmatpush.msra.mxu0 %v2941_v49 }
 0x811   :  { %v2673_v12 = vpop.f32.mrf.mxu2  ;;  %2999 = vmatpush.msrb.mxu1 %v2979_v55 }
 0x812   :  { %3227 = vmatmul.msk.f32.vlgmr.msrb.gmra.mxu2 %vm870_vm11, %v2673_v12 }
 0x813   :  { %v2650_v13 = vpop.f32.mrf.mxu1  ;;  %3000 = vmatpush.msrb.mxu1 %v2978_v57 }
 0x814   :  { %v2627_v16 = vpop.f32.mrf.mxu0  ;;  %3226 = vmatmul.msk.f32.vlgmr.msra.gmra.mxu1 %vm870_vm11, %v2650_v13 }
 0x815   :  { %3225 = vmatmul.msk.f32.vlgmr.msrb.gmra.mxu0 %vm870_vm11, %v2627_v16  ;;  %3001 = vmatpush.msrb.mxu1 %v2977_v62 }
 0x817   :  { %3002 = vmatpush.msrb.mxu1 %v2976_v1 }
 0x818   :  { %v2696_v17 = vpop.f32.mrf.mxu3 }
 0x819   :  { %3228 = vmatmul.msk.f32.vlgmr.msra.gmra.mxu3 %vm870_vm11, %v2696_v17 }
 0x889   :  { %v2742_v44 = vpop.f32.mrf.mxu1 }
 0x88a   :  { %v2719_v18 = vpop.f32.mrf.mxu0  ;;  %v2884_v19 = vsel %vm120_vm2, %v2742_v44, 0.0  ;;  %v2975_v44 = vld [vmem:[%s4658_s20 + $0x8] sm:$0xff] }
 0x88b   :  { %v2883_v20 = vsel %vm120_vm2, %v2719_v18, 0.0  ;;  %3003 = vmatpush.msrb.mxu1 %v2975_v44  ;;  %v2974_v18 = vld [vmem:[%s4658_s20] sm:$0xff] }
 0x88c   :  { %v2885_v21 = vadd.f32 %v2884_v19, %v2883_v20  ;;  %v2788_v45 = vpop.f32.mrf.mxu3 }
 0x88d   :  { %v2765_v23 = vpop.f32.mrf.mxu2  ;;  %v2888_v22 = vsel %vm120_vm2, %v2788_v45, 0.0  ;;  %3004 = vmatpush.msrb.mxu1 %v2974_v18 }
 0x88e   :  { %v2886_v24 = vsel %vm120_vm2, %v2765_v23, 0.0 }
 0x88f   :  { %v2887_v25 = vadd.f32 %v2886_v24, %v2885_v21 }
 0x891   :  { %v2889_v26 = vadd.f32 %v2888_v22, %v2887_v25  ;;  %v2834_v15 = vpop.f32.mrf.mxu1 }
 0x892   :  { %v2811_v29 = vpop.f32.mrf.mxu0  ;;  %v2891_v35 = vsel %vm120_vm2, %v2834_v15, 0.0 }
 0x893   :  { %v4552_v28 = vadd.f32 %v2889_v26, %v4040_v14  ;;  %v2890_v33 = vsel %vm120_vm2, %v2811_v29, 0.0 }
 0x894   :  { %v2892_v37 = vadd.f32 %v2891_v35, %v2890_v33  ;;  %v3057_v33 = vld [vmem:[%s4661_s23 + $0x8] sm:$0xff]  ;;  %v3056_v35 = vld [vmem:[%s4661_s23] sm:$0xff] }
 0x895   :  { %v2900_v31 = vmul.f32 %v4552_v28, %v4552_v28  ;;  %v2857_v32 = vpop.f32.mrf.mxu2 }
 0x896   :  { %v2893_v36 = vsel %vm120_vm2, %v2857_v32, 0.0  ;;  %v3059_v32 = vld [vmem:[%s4661_s23 + $0x18] sm:$0xff] }
 0x897   :  { %v2902_v27 = vsel %vm120_vm2, %v2900_v31, 0.0  ;;  %v2894_v38 = vadd.f32 %v2893_v36, %v2892_v37  ;;  %3078 = vmatpush.msra.mxu2 %v3059_v32 }
 0x898   :  { %2903 = vadd.xlane.f32.xlu2 %v2902_v27 }
 0x89c   :  { %v2880_v39 = vpop.f32.mrf.mxu3 }
 0x89d   :  { %v2895_v14 = vsel %vm120_vm2, %v2880_v39, 0.0 }
 0x89e   :  { %v2896_v41 = vadd.f32 %v2895_v14, %v2894_v38 }
 0x8a0   :  { %v4562_v42 = vadd.f32 %v2896_v41, %v4055_v30  ;;  %v2940_v30 = vld [vmem:[%s4657_s19 + $0x8] sm:$0xff] }
 0x8a1   :  { %2963 = vmatpush.msra.mxu0 %v2940_v30  ;;  %v3256_v30 = vld [vmem:[%s4659_s21] ss:$0 sm:$0xff]  ;;  %s3372_s21 = smov [#allocation2]  }
 0x8a2   :  { %v2901_v43 = vmul.f32 %v4562_v42, %v4562_v42  ;;  %s3097_s27 = sshll.u32 %s3372_s21, 4  ;;  %s3098_s27 = int_to_ptr.vmem [resolvable:$true] %s3097_s27 }
 0x8a3   :  { %2964 = vmatpush.msra.mxu0 %v2939_v50 }
 0x8a4   :  { %v2905_v47 = vsel %vm120_vm2, %v2901_v43, 0.0 }
 0x8a5   :  { %2906 = vadd.xlane.f32.xlu0 %v2905_v47 }
 0x90b   :  { %v2904_v51 = vpop.xlane.xlu2 %2903 }
 0x90c   :  { %v2908_v52 = vmul.f32 %v2904_v51, %v3638_v60 }
 0x90e   :  { %v2910_v34 = vadd.f32 1e-06, %v2908_v52 }
 0x910   :  { %3335 = vrsqrt.f32 %v2910_v34  ;;  %vm2918_vm10 = vweird.f32 %v2910_v34 }
 0x916   :  { %v3336_v46 = vpop.eup %3335 }
 0x917   :  { %v2913_v56 = vmul.f32 %v3336_v46, %v2910_v34  ;;  %vm2919_vm9 = vweird.f32 %v3336_v46 }
 0x918   :  { %v2907_v58 = vpop.xlane.xlu0 %2906  ;;  %vm2920_vm11 = vmor %vm2918_vm10, %vm2919_vm9 }
 0x919   :  { %v2914_v59 = vmul.f32 %v3336_v46, %v2913_v56  ;;  %v2909_v61 = vmul.f32 %v2907_v58, %v3638_v60 }
 0x91b   :  { %v2915_v63 = vmul.f32 0.5, %v2914_v59  ;;  %v2911_v0 = vadd.f32 1e-06, %v2909_v61 }
 0x91d   :  { %v2916_v2 = vsub.f32 1.5, %v2915_v63  ;;  %3337 = vrsqrt.f32 %v2911_v0  ;;  %vm2928_vm13 = vweird.f32 %v2911_v0 }
 0x91f   :  { %v2917_v3 = vmul.f32 %v3336_v46, %v2916_v2 }
 0x921   :  { %v2921_v5 = vsel %vm2920_vm11, %v3336_v46, %v2917_v3 }
 0x922   :  { %v2932_v6 = vmul.f32 %v2921_v5, %v4552_v28 }
 0x923   :  { %v3338_v7 = vpop.eup %3337 }
 0x924   :  { %v2937_v40 = vmul.f32 %v3255_v4, %v2932_v6  ;;  %v2923_v8 = vmul.f32 %v3338_v7, %v2911_v0  ;;  %vm2929_vm12 = vweird.f32 %v3338_v7 }
 0x925   :  { %vm2930_vm14 = vmor %vm2928_vm13, %vm2929_vm12 }
 0x926   :  { %v2924_v9 = vmul.f32 %v3338_v7, %v2923_v8  ;;  %3229 = vmatmul.msk.f32.vlgmr.msra.gmra.mxu0 %vm120_vm2, %v2937_v40 }
 0x928   :  { %v2925_v10 = vmul.f32 0.5, %v2924_v9 }
 0x92a   :  { %v2926_v11 = vsub.f32 1.5, %v2925_v10 }
 0x92c   :  { %v2927_v12 = vmul.f32 %v3338_v7, %v2926_v11 }
 0x92e   :  { %v2931_v13 = vsel %vm2930_vm14, %v3338_v7, %v2927_v12 }
 0x92f   :  { %v2933_v16 = vmul.f32 %v2931_v13, %v4562_v42 }
 0x931   :  { %v2938_v17 = vmul.f32 %v3255_v4, %v2933_v16 }
 0x933   :  { %3230 = vmatmul.msk.f32.gmra.mxu0 %vm120_vm2, %v2938_v17 }
 0x9a3   :  { %v2966_v19 = vpop.f32.mrf.mxu0 }
 0x9a4   :  { %v2972_v20 = vmax.f32 %v2966_v19, 0.0 }
 0x9a6   :  { %3231 = vmatmul.msk.f32.vlgmr.msrb.gmra.mxu1 %vm2982_vm15, %v2972_v20 }
 0x9b0   :  { %v2969_v21 = vpop.f32.mrf.mxu0 }
 0x9b1   :  { %v2973_v23 = vmax.f32 %v2969_v21, 0.0 }
 0x9b3   :  { %3232 = vmatmul.msk.f32.gmra.mxu1 %vm2982_vm15, %v2973_v23 }
 0xa23   :  { %v3006_v45 = vpop.f32.mrf.mxu1 }
 0xa24   :  { %v3012_v24 = vadd.f32 %v3006_v45, %v4552_v28  ;;  %v3058_v28 = vld [vmem:[%s4661_s23 + $0x10] sm:$0xff] }
 0xa25   :  { %3079 = vmatpush.msra.mxu2 %v3058_v28 }
 0xa26   :  { %v3015_v25 = vmul.f32 %v3012_v24, %v3012_v24 }
 0xa27   :  { %3080 = vmatpush.msra.mxu2 %v3057_v33 }
 0xa28   :  { %v3017_v22 = vsel %vm120_vm2, %v3015_v25, 0.0 }
 0xa29   :  { %3018 = vadd.xlane.f32.xlu1 %v3017_v22  ;;  %3081 = vmatpush.msra.mxu2 %v3056_v35 }
 0xa30   :  { %v3009_v26 = vpop.f32.mrf.mxu1 }
 0xa31   :  { %v3013_v29 = vadd.f32 %v3009_v26, %v4562_v42 }
 0xa33   :  { %v3016_v15 = vmul.f32 %v3013_v29, %v3013_v29 }
 0xa35   :  { %v3020_v31 = vsel %vm120_vm2, %v3016_v15, 0.0 }
 0xa36   :  { %3021 = vadd.xlane.f32.xlu2 %v3020_v31 }
 0xa9c   :  { %v3019_v27 = vpop.xlane.xlu1 %3018 }
 0xa9d   :  { %v3023_v36 = vmul.f32 %v3019_v27, %v3638_v60 }
 0xa9f   :  { %v3025_v37 = vadd.f32 1e-06, %v3023_v36 }
 0xaa1   :  { %3339 = vrsqrt.f32 %v3025_v37  ;;  %vm3033_vm1 = vweird.f32 %v3025_v37 }
 0xaa7   :  { %v3340_v38 = vpop.eup %3339 }
 0xaa8   :  { %v3028_v39 = vmul.f32 %v3340_v38, %v3025_v37  ;;  %vm3034_vm0 = vweird.f32 %v3340_v38 }
 0xaa9   :  { %v3022_v14 = vpop.xlane.xlu2 %3021  ;;  %vm3035_vm3 = vmor %vm3033_vm1, %vm3034_vm0 }
 0xaaa   :  { %v3029_v41 = vmul.f32 %v3340_v38, %v3028_v39  ;;  %v3024_v42 = vmul.f32 %v3022_v14, %v3638_v60 }
 0xaac   :  { %v3030_v43 = vmul.f32 0.5, %v3029_v41  ;;  %v3026_v47 = vadd.f32 1e-06, %v3024_v42 }
 0xaae   :  { %v3031_v48 = vsub.f32 1.5, %v3030_v43  ;;  %3341 = vrsqrt.f32 %v3026_v47  ;;  %vm3043_vm5 = vweird.f32 %v3026_v47 }
 0xab0   :  { %v3032_v49 = vmul.f32 %v3340_v38, %v3031_v48 }
 0xab2   :  { %v3036_v50 = vsel %vm3035_vm3, %v3340_v38, %v3032_v49 }
 0xab3   :  { %v3047_v51 = vmul.f32 %v3036_v50, %v3012_v24 }
 0xab4   :  { %v3342_v52 = vpop.eup %3341 }
 0xab5   :  { %v3052_v34 = vmul.f32 %v3256_v30, %v3047_v51  ;;  %v3038_v53 = vmul.f32 %v3342_v52, %v3026_v47  ;;  %vm3044_vm4 = vweird.f32 %v3342_v52 }
 0xab6   :  { %vm3045_vm6 = vmor %vm3043_vm5, %vm3044_vm4 }
 0xab7   :  { %v3054_v54 = vmul.f32 0.17677669, %v3052_v34  ;;  %v3039_v55 = vmul.f32 %v3342_v52, %v3038_v53 }
 0xab9   :  { %v3040_v60 = vmul.f32 0.5, %v3039_v55  ;;  %3233 = vmatmul.msk.f32.vlgmr.msra.gmra.mxu2 %vm120_vm2, %v3054_v54 }
 0xabb   :  { %v3041_v46 = vsub.f32 1.5, %v3040_v60 }
 0xabd   :  { %v3042_v56 = vmul.f32 %v3342_v52, %v3041_v46 }
 0xabf   :  { %v3046_v57 = vsel %vm3045_vm6, %v3342_v52, %v3042_v56 }
 0xac0   :  { %v3048_v58 = vmul.f32 %v3046_v57, %v3013_v29 }
 0xac2   :  { %v3053_v59 = vmul.f32 %v3256_v30, %v3048_v58 }
 0xac4   :  { %v3055_v61 = vmul.f32 0.17677669, %v3053_v59 }
 0xac6   :  { %3234 = vmatmul.msk.f32.gmra.mxu2 %vm120_vm2, %v3055_v61 }
 0xb3c   :  { %v3083_v62 = vpop.f32.mrf.mxu2 }
 0xb3d   :  { %v3089_v63 = vmax.f32 %v3083_v62, -100.0 }
 0xb3f   :  { %3091 = vst [vmem:[#allocation2] sm:$0xff] %v3089_v63 }
 0xb49   :  { %v3086_v0 = vpop.f32.mrf.mxu2 }
 0xb4a   :  { %v3090_v1 = vmax.f32 %v3086_v0, -100.0 }
 0xb4c   :  { %3092 = vst [vmem:[#allocation2 + $0x8] sm:$0xff] %v3090_v1 }
 0xb4d   :  { %3105 = dma.vmem_to_hbm [thread:$0]  %s3098_s27, 256, %s3100_s9, [#allocation3], %s3373_s12, %s3373_s12, %s3374_s0  }
 0xb4e   :  { %3367 = dma.done.wait [#allocation3], 256  }
 0xb4f   :  { %3368 = vsyncadd [#allocation3], 4294967040 }
 0xb50   :  { %3110 = vsyncpa [#allocation3], 1 }

</bundles_post_ra>
